<compile_context>
chip_gen: v6e
topology: v6e:2x2x1
jax: 0.10.0
libtpu: 0.0.40
codegen_flags: <defaults>
</compile_context>

<pallas_src>
import functools
import math

import jax
import jax.numpy as jnp
from jax import lax
from jax.experimental import pallas as pl
from jax.experimental.pallas import tpu as pltpu


_VMEM_LIMIT = 64 * 1024 * 1024   # explicit scoped-VMEM limit (v5e/v6e default is 16/32 MiB)


# ---------------------------------------------------------------------------
# small helpers
# ---------------------------------------------------------------------------

def _round_up(n, m):
    return (n + m - 1) // m * m


def _gelu_tanh(x):
    # tanh-approximate GELU (lowers to the EUP tanh slot).
    # TODO(synk): PyTorch nn.GELU() defaults to the exact erf form (~1e-3 delta).
    c = math.sqrt(2.0 / math.pi)
    return 0.5 * x * (1.0 + jnp.tanh(c * (x + 0.044715 * x * x * x)))


def _pick_row_tile(m, max_tile=512):
    """Row (sublane) tile: multiple of 8, divides m (no pad/slice round trips),
    <= max_tile, and leaves >= 2 grid steps so both v7x TensorCores get work."""
    if m % 8 != 0:                                  # rare fallback: padded tail
        return min(_round_up(m, 8), max_tile)
    best = 8
    for t in range(8, min(m, max_tile) + 1, 8):
        if m % t == 0 and m // t >= 2:
            best = t
    return best


def _pad_rows(x, mp):
    if x.shape[0] == mp:
        return x
    return jnp.pad(x, ((0, mp - x.shape[0]), (0, 0)))


# ---------------------------------------------------------------------------
# Pallas kernels
# ---------------------------------------------------------------------------

def _glu_ff1_kernel(x_ref, w_ref, b_ref, o_ref, *, n):
    """o = GLU(x @ w + b).  One wide bf16 MXU matmul (fills the 256-wide MXU
    on v6e/v7x); the value/gate split is free when n % 128 == 0."""
    x = x_ref[...].astype(jnp.bfloat16)                       # MXU operand in bf16
    h = jnp.dot(x, w_ref[...], preferred_element_type=jnp.float32) + b_ref[...]
    o_ref[...] = (h[:, :n] * jax.nn.sigmoid(h[:, n:])).astype(o_ref.dtype)


def _gconv_epilogue_kernel(yf_ref, u_ref, xin_ref, dsk_ref, wo_ref, bo_ref,
                           w2_ref, b2_ref, g_ref, beta_ref, o_ref,
                           *, channels, eps):
    """Fused GConv epilogue + block tail, single pass over the token tile:
         y   = GELU(y_fft + D_skip)    D_skip[:, c*H+h] = u[:, h] * D[c, h]
         h   = y @ Wo + bo             (GConv output_linear, C*H -> H)
         h   = GELU(h @ W2 + b2)       (ff2)
         out = LayerNorm(h + x_in)
       Removes three (M, D) f32 HBM round trips vs. separate kernels."""
    u = u_ref[...].astype(jnp.float32)
    skip = jnp.concatenate([u] * channels, axis=-1) * dsk_ref[...]
    y = _gelu_tanh(yf_ref[...].astype(jnp.float32) + skip)
    # bf16 MXU operands, f32 accumulation; elementwise math stays f32 (v5e-safe).
    h = jnp.dot(y.astype(jnp.bfloat16), wo_ref[...],
                preferred_element_type=jnp.float32) + bo_ref[...]
    h = jnp.dot(h.astype(jnp.bfloat16), w2_ref[...],
                preferred_element_type=jnp.float32) + b2_ref[...]
    h = _gelu_tanh(h)
    x = h + xin_ref[...].astype(jnp.float32)
    # Two-pass LayerNorm (mean, then centered variance) -> no E[x^2]-E[x]^2
    # cancellation; rsqrt runs on the EUP.
    mean = jnp.mean(x, axis=-1, keepdims=True)
    c = x - mean
    var = jnp.mean(c * c, axis=-1, keepdims=True)
    o_ref[...] = (c * lax.rsqrt(var + eps) * g_ref[...]
                  + beta_ref[...]).astype(o_ref.dtype)


# ---------------------------------------------------------------------------
# shared row-tiled launcher
# ---------------------------------------------------------------------------

def _row_call(kernel, row_inputs, res_inputs, out_dtype, out_width, *, max_tile=512):
    """Row-tile over the flattened token axis M.  `row_inputs` are (M, *)
    activations tiled per grid step; `res_inputs` are grid-resident weights /
    bias rows (index_map -> (0, 0))."""
    m = row_inputs[0].shape[0]
    tm = _pick_row_tile(m, max_tile)
    mp = _round_up(m, tm)
    padded = mp != m
    if padded:                                   # rare: M not 8-aligned
        row_inputs = [_pad_rows(r, mp) for r in row_inputs]
    in_specs = ([pl.BlockSpec((tm, r.shape[1]), lambda i: (i, 0)) for r in row_inputs]
                + [pl.BlockSpec(r.shape, lambda i: (0, 0)) for r in res_inputs])
    out = pl.pallas_call(
        kernel,
        out_shape=jax.ShapeDtypeStruct((mp, out_width), out_dtype),
        grid_spec=pltpu.PrefetchScalarGridSpec(
            num_scalar_prefetch=0,
            grid=(mp // tm,),
            in_specs=in_specs,
            out_specs=pl.BlockSpec((tm, out_width), lambda i: (i, 0)),
        ),
        compiler_params=pltpu.CompilerParams(
            dimension_semantics=("parallel",),
            vmem_limit_bytes=_VMEM_LIMIT),
    )(*row_inputs, *res_inputs)
    return out[:m] if padded else out


def glu_ff1(x2d, w1_t, b1):
    """GLU(nn.Linear(D, 2D)(x)); weights fed to the MXU in bf16."""
    two_n = w1_t.shape[1]
    n = two_n // 2
    kernel = functools.partial(_glu_ff1_kernel, n=n)
    return _row_call(kernel, [x2d],
                     [w1_t.astype(jnp.bfloat16), b1.reshape(1, two_n)],
                     x2d.dtype, n, max_tile=1024)


def gconv_epilogue(yf, u_tok, x_flat, params, *, channels, eps=1e-5):
    """Fused D-skip + GELU + output_linear + ff2 + GELU + residual + LayerNorm."""
    d = x_flat.shape[1]
    res = [params["D"].reshape(1, channels * d).astype(jnp.float32),
           params["wo_t"].astype(jnp.bfloat16),
           params["bo"].reshape(1, d),
           params["w2_t"].astype(jnp.bfloat16),
           params["b2"].reshape(1, d),
           params["ln_g"].reshape(1, d),
           params["ln_b"].reshape(1, d)]
    kernel = functools.partial(_gconv_epilogue_kernel, channels=channels, eps=eps)
    return _row_call(kernel, [yf, u_tok, x_flat], res, x_flat.dtype, d,
                     max_tile=512)


# ---------------------------------------------------------------------------
# GConv: multi-scale kernel construction + FFT long convolution (XLA side)
# ---------------------------------------------------------------------------

def _build_gconv_kernel(kernel_list, multiplier, L, init_scale=0):
    """mode='cat_randn': interpolate each scale, scale by multiplier power,
    concatenate, record L2 norm (first-forward kernel_norm), crop/pad to L,
    normalize."""
    num_scales = len(kernel_list)
    pieces = []
    for i, k in enumerate(kernel_list):
        c, h, kd = k.shape
        new_len = kd * (2 ** (max(0, i - 1) + init_scale))
        if new_len != kd:
            # TODO(synk): jax.image.resize(linear) approximates
            # F.interpolate(mode='linear', align_corners=False).
            k = jax.image.resize(k, (c, h, new_len), method="linear")
        pieces.append(k * multiplier ** (num_scales - i - 1))
    k = jnp.concatenate(pieces, axis=-1)
    kernel_norm = jnp.sqrt(jnp.sum(k * k, axis=-1, keepdims=True))
    lk = k.shape[-1]
    if lk > L:
        k = k[..., :L]
    elif lk < L:
        k = jnp.pad(k, ((0, 0), (0, 0), (0, L - lk)))
    return k / kernel_norm


def _fft_long_conv(u, k, bidirectional):
    """u (B,H,L), k (C or 2C, H, L) -> (B, C, H, L).  D-skip / GELU /
    output_linear are fused into the Pallas epilogue kernel downstream."""
    B, H, L = u.shape
    if bidirectional:
        c = k.shape[0] // 2
        k = (jnp.pad(k[:c], ((0, 0), (0, 0), (0, L)))
             + jnp.pad(jnp.flip(k[c:], axis=-1), ((0, 0), (0, 0), (L, 0))))
    # TODO(synk): rfft / complex product / irfft have no Pallas TPU equivalent;
    # the FFT long convolution stays in XLA.
    k_f = jnp.fft.rfft(k, n=2 * L)
    u_f = jnp.fft.rfft(u, n=2 * L)
    return jnp.fft.irfft(jnp.einsum("bhl,chl->bchl", u_f, k_f), n=2 * L)[..., :L]


# ---------------------------------------------------------------------------
# SGConvBlock forward
# ---------------------------------------------------------------------------

def sgconv_block_forward(x_in, params, *, channels, bidirectional):
    B, L, D = x_in.shape
    x_flat = x_in.reshape(B * L, D)

    # ff1 + GLU (one wide bf16 MXU matmul, fused gate) -> token layout (M, D)
    u_tok = glu_ff1(x_flat, params["w1_t"], params["b1"])

    # GConv FFT long convolution (XLA) on (B, H, L)
    u = jnp.swapaxes(u_tok.reshape(B, L, D), -1, -2)
    k = _build_gconv_kernel(params["kernel_list"], params["multiplier"], L)
    y = _fft_long_conv(u, k, bidirectional)                      # (B, C, H, L)
    yf = jnp.transpose(y, (0, 3, 1, 2)).reshape(B * L, channels * D)

    # Fused epilogue: D-skip + GELU + output_linear + ff2 + GELU + residual + LN
    out = gconv_epilogue(yf, u_tok, x_flat, params, channels=channels)
    return out.reshape(B, L, D)


# ---------------------------------------------------------------------------
# parameters & pure-JAX reference
# ---------------------------------------------------------------------------

def init_params(key, input_dim, channels, bidirectional, *, kernel_dim=64,
                l_max=256, decay_min=2.0, decay_max=2.0):
    d = input_dim
    num_scales = 1 + math.ceil(math.log2(l_max / kernel_dim))
    kc = channels * 2 if bidirectional else channels
    keys = jax.random.split(key, 5 + num_scales)
    return {
        # ff1: nn.Linear(d, 2d) (stored transposed as (in, out))
        "w1_t": jax.random.normal(keys[0], (d, 2 * d), jnp.float32) / math.sqrt(d),
        "b1": jnp.zeros((2 * d,), jnp.float32),
        # GConv skip matrix D: (channels, h)
        "D": jax.random.normal(keys[1], (channels, d), jnp.float32),
        # GConv multi-scale kernels, mode='cat_randn': (kc, h, kernel_dim) each
        "kernel_list": [
            jax.random.normal(keys[2 + i], (kc, d, kernel_dim), jnp.float32)
            for i in range(num_scales)
        ],
        # buffer: linspace(decay_min, decay_max, h).view(1, h, 1)
        "multiplier": jnp.linspace(decay_min, decay_max, d).reshape(1, d, 1),
        # GConv output_linear: nn.Linear(channels*h, h)
        "wo_t": jax.random.normal(keys[2 + num_scales], (channels * d, d),
                                  jnp.float32) / math.sqrt(channels * d),
        "bo": jnp.zeros((d,), jnp.float32),
        # ff2: nn.Linear(d, d)
        "w2_t": jax.random.normal(keys[3 + num_scales], (d, d),
                                  jnp.float32) / math.sqrt(d),
        "b2": jnp.zeros((d,), jnp.float32),
        # final nn.LayerNorm(d)
        "ln_g": jnp.ones((d,), jnp.float32),
        "ln_b": jnp.zeros((d,), jnp.float32),
    }


def reference_forward(x_in, params, *, bidirectional):
    """Pure jnp forward (no Pallas, all-f32 matmuls) with identical semantics."""
    B, L, D = x_in.shape
    h1 = x_in @ params["w1_t"] + params["b1"]
    a, g = jnp.split(h1, 2, axis=-1)
    x = a * jax.nn.sigmoid(g)                              # GLU
    u = jnp.swapaxes(x, -1, -2)                            # (B, H, L)
    k = _build_gconv_kernel(params["kernel_list"], params["multiplier"], L)
    y = _fft_long_conv(u, k, bidirectional)                # (B, C, H, L)
    y = y + jnp.einsum("bhl,ch->bchl", u, params["D"])     # D skip
    y = _gelu_tanh(y)                                      # GConv activation
    C = y.shape[1]
    y = jnp.transpose(y, (0, 3, 1, 2)).reshape(B, L, C * D)
    y = y @ params["wo_t"] + params["bo"]                  # output_linear
    y = _gelu_tanh(y @ params["w2_t"] + params["b2"])      # ff2 + GELU
    y = y + x_in                                           # residual
    mean = jnp.mean(y, axis=-1, keepdims=True)
    var = jnp.mean((y - mean) ** 2, axis=-1, keepdims=True)
    return (y - mean) / jnp.sqrt(var + 1e-5) * params["ln_g"] + params["ln_b"]


# ---------------------------------------------------------------------------
# main
# ---------------------------------------------------------------------------

if __name__ == "__main__":
    # D=128 keeps every feature/lane width (D, 2D, C*H) a multiple of 128
    # -> lane-dense unmasked stores and full MXU column utilization.
    B, L, D = 2, 64, 128
    channels = 2
    bidirectional = True
    l_max = 256                                            # -> 3 kernel scales

    key = jax.random.PRNGKey(0)
    k_x, k_p = jax.random.split(key)
    x_in = jax.random.normal(k_x, (B, L, D), dtype=jnp.float32)
    params = init_params(k_p, D, channels, bidirectional,
                         kernel_dim=64, l_max=l_max)

    fwd = jax.jit(functools.partial(sgconv_block_forward,
                                    channels=channels,
                                    bidirectional=bidirectional))
    y = jax.block_until_ready(fwd(x_in, params))

    y_ref = reference_forward(x_in, params, bidirectional=bidirectional)
    assert y.shape == x_in.shape
    # Tolerance dominated by bf16 MXU operands (f32 accumulation) in the Pallas
    # path vs. the all-f32 XLA reference; structural bugs show up as O(1).
    err = float(jnp.max(jnp.abs(y - y_ref)))
    assert jnp.allclose(y, y_ref, atol=1e-1, rtol=1e-1), f"max abs err {err}"

    print("KERNEL_OK")
</pallas_src>

<mosaic_0001>
module attributes {stable_mosaic.version = 11 : i64} {
  func.func @_glu_ff1_kernel(%arg0: i32, %arg1: memref<64x128xf32, #tpu.memory_space<vmem>>, %arg2: memref<128x256xbf16, #tpu.memory_space<vmem>>, %arg3: memref<1x256xf32, #tpu.memory_space<vmem>>, %arg4: memref<64x128xf32, #tpu.memory_space<vmem>>) attributes {dimension_semantics = [#tpu.dimension_semantics<parallel>], iteration_bounds = array<i64: 2>, scalar_prefetch = 0 : i64, scratch_operands = 0 : i64, tpu.core_type = #tpu.core_type<tc>, window_params = [{transform_indices = @transform_0, window_bounds = array<i64: 64, 128>}, {pipeline_mode = #tpu.pipeline_mode<synchronous>, transform_indices = @transform_1, window_bounds = array<i64: 128, 256>}, {pipeline_mode = #tpu.pipeline_mode<synchronous>, transform_indices = @transform_2, window_bounds = array<i64: 1, 256>}, {transform_indices = @transform_3, window_bounds = array<i64: 64, 128>}]} {
    %c0 = arith.constant 0 : index
    %c0_0 = arith.constant 0 : index
    %0 = vector.load %arg1[%c0, %c0_0] : memref<64x128xf32, #tpu.memory_space<vmem>>, vector<64x128xf32>
    %1 = arith.truncf %0 : vector<64x128xf32> to vector<64x128xbf16>
    %c0_1 = arith.constant 0 : index
    %c0_2 = arith.constant 0 : index
    %2 = vector.load %arg2[%c0_1, %c0_2] : memref<128x256xbf16, #tpu.memory_space<vmem>>, vector<128x256xbf16>
    %cst = arith.constant dense<0.000000e+00> : vector<64x256xf32>
    %3 = tpu.matmul %1, %2, %cst {dimension_numbers = #tpu.dot_dimension_numbers<[1], [0], [0], [1], [0, 0, 1, 1], [], []>} : vector<64x128xbf16>, vector<128x256xbf16>, vector<64x256xf32> -> vector<64x256xf32>
    %c0_3 = arith.constant 0 : index
    %c0_4 = arith.constant 0 : index
    %4 = vector.load %arg3[%c0_3, %c0_4] : memref<1x256xf32, #tpu.memory_space<vmem>>, vector<1x256xf32>
    %5 = vector.broadcast %4 : vector<1x256xf32> to vector<64x256xf32>
    %6 = arith.addf %3, %5 : vector<64x256xf32>
    %7 = vector.extract_strided_slice %6 {offsets = [0, 0], sizes = [64, 128], strides = [1, 1]} : vector<64x256xf32> to vector<64x128xf32>
    %8 = vector.extract_strided_slice %6 {offsets = [0, 128], sizes = [64, 128], strides = [1, 1]} : vector<64x256xf32> to vector<64x128xf32>
    %9 = arith.negf %8 : vector<64x128xf32>
    %10 = math.exp %9 : vector<64x128xf32>
    %cst_5 = arith.constant 1.000000e+00 : f32
    %11 = vector.broadcast %cst_5 : f32 to vector<64x128xf32>
    %12 = arith.addf %11, %10 : vector<64x128xf32>
    %13 = arith.divf %11, %12 : vector<64x128xf32>
    %14 = arith.mulf %7, %13 : vector<64x128xf32>
    %c0_6 = arith.constant 0 : index
    %c0_7 = arith.constant 0 : index
    %15 = vector.load %arg4[%c0_6, %c0_7] : memref<64x128xf32, #tpu.memory_space<vmem>>, vector<64x128xf32>
    tpu.vector_store %arg4[%c0_6, %c0_7], %14 {strides = array<i32>} : memref<64x128xf32, #tpu.memory_space<vmem>>, vector<64x128xf32>,
    return
  }
  func.func @transform_0(%arg0: i32) -> (i32, i32) {
    %c0_i32 = arith.constant 0 : i32
    %c0_i32_0 = arith.constant 0 : i32
    return %arg0, %c0_i32 : i32, i32
  }
  func.func @transform_1(%arg0: i32) -> (i32, i32) {
    %c0_i32 = arith.constant 0 : i32
    %c0_i32_0 = arith.constant 0 : i32
    %c0_i32_1 = arith.constant 0 : i32
    return %c0_i32, %c0_i32_0 : i32, i32
  }
  func.func @transform_2(%arg0: i32) -> (i32, i32) {
    %c0_i32 = arith.constant 0 : i32
    %c0_i32_0 = arith.constant 0 : i32
    %c0_i32_1 = arith.constant 0 : i32
    return %c0_i32, %c0_i32_0 : i32, i32
  }
  func.func @transform_3(%arg0: i32) -> (i32, i32) {
    %c0_i32 = arith.constant 0 : i32
    %c0_i32_0 = arith.constant 0 : i32
    return %arg0, %c0_i32 : i32, i32
  }
}

module attributes {stable_mosaic.version = 11 : i64} {
  func.func @_gconv_epilogue_kernel(%arg0: i32, %arg1: memref<64x256xf32, #tpu.memory_space<vmem>>, %arg2: memref<64x128xf32, #tpu.memory_space<vmem>>, %arg3: memref<64x128xf32, #tpu.memory_space<vmem>>, %arg4: memref<1x256xf32, #tpu.memory_space<vmem>>, %arg5: memref<256x128xbf16, #tpu.memory_space<vmem>>, %arg6: memref<1x128xf32, #tpu.memory_space<vmem>>, %arg7: memref<128x128xbf16, #tpu.memory_space<vmem>>, %arg8: memref<1x128xf32, #tpu.memory_space<vmem>>, %arg9: memref<1x128xf32, #tpu.memory_space<vmem>>, %arg10: memref<1x128xf32, #tpu.memory_space<vmem>>, %arg11: memref<64x128xf32, #tpu.memory_space<vmem>>) attributes {dimension_semantics = [#tpu.dimension_semantics<parallel>], iteration_bounds = array<i64: 2>, scalar_prefetch = 0 : i64, scratch_operands = 0 : i64, tpu.core_type = #tpu.core_type<tc>, window_params = [{transform_indices = @transform_0, window_bounds = array<i64: 64, 256>}, {transform_indices = @transform_1, window_bounds = array<i64: 64, 128>}, {transform_indices = @transform_2, window_bounds = array<i64: 64, 128>}, {pipeline_mode = #tpu.pipeline_mode<synchronous>, transform_indices = @transform_3, window_bounds = array<i64: 1, 256>}, {pipeline_mode = #tpu.pipeline_mode<synchronous>, transform_indices = @transform_4, window_bounds = array<i64: 256, 128>}, {pipeline_mode = #tpu.pipeline_mode<synchronous>, transform_indices = @transform_5, window_bounds = array<i64: 1, 128>}, {pipeline_mode = #tpu.pipeline_mode<synchronous>, transform_indices = @transform_6, window_bounds = array<i64: 128, 128>}, {pipeline_mode = #tpu.pipeline_mode<synchronous>, transform_indices = @transform_7, window_bounds = array<i64: 1, 128>}, {pipeline_mode = #tpu.pipeline_mode<synchronous>, transform_indices = @transform_8, window_bounds = array<i64: 1, 128>}, {pipeline_mode = #tpu.pipeline_mode<synchronous>, transform_indices = @transform_9, window_bounds = array<i64: 1, 128>}, {transform_indices = @transform_10, window_bounds = array<i64: 64, 128>}]} {
    %c0 = arith.constant 0 : index
    %c0_0 = arith.constant 0 : index
    %0 = vector.load %arg2[%c0, %c0_0] : memref<64x128xf32, #tpu.memory_space<vmem>>, vector<64x128xf32>
    %1 = tpu.concatenate %0, %0 in 1 : vector<64x128xf32>, vector<64x128xf32> -> vector<64x256xf32>
    %c0_1 = arith.constant 0 : index
    %c0_2 = arith.constant 0 : index
    %2 = vector.load %arg4[%c0_1, %c0_2] : memref<1x256xf32, #tpu.memory_space<vmem>>, vector<1x256xf32>
    %3 = vector.broadcast %2 : vector<1x256xf32> to vector<64x256xf32>
    %4 = arith.mulf %1, %3 : vector<64x256xf32>
    %c0_3 = arith.constant 0 : index
    %c0_4 = arith.constant 0 : index
    %5 = vector.load %arg1[%c0_3, %c0_4] : memref<64x256xf32, #tpu.memory_space<vmem>>, vector<64x256xf32>
    %6 = arith.addf %5, %4 : vector<64x256xf32>
    %cst = arith.constant 5.000000e-01 : f32
    %7 = vector.broadcast %cst : f32 to vector<64x256xf32>
    %8 = arith.mulf %7, %6 : vector<64x256xf32>
    %cst_5 = arith.constant 4.471500e-02 : f32
    %9 = vector.broadcast %cst_5 : f32 to vector<64x256xf32>
    %10 = arith.mulf %9, %6 : vector<64x256xf32>
    %11 = arith.mulf %10, %6 : vector<64x256xf32>
    %12 = arith.mulf %11, %6 : vector<64x256xf32>
    %13 = arith.addf %6, %12 : vector<64x256xf32>
    %cst_6 = arith.constant 0.797884583 : f32
    %14 = vector.broadcast %cst_6 : f32 to vector<64x256xf32>
    %15 = arith.mulf %14, %13 : vector<64x256xf32>
    %16 = math.tanh %15 : vector<64x256xf32>
    %cst_7 = arith.constant 1.000000e+00 : f32
    %17 = vector.broadcast %cst_7 : f32 to vector<64x256xf32>
    %18 = arith.addf %17, %16 : vector<64x256xf32>
    %19 = arith.mulf %8, %18 : vector<64x256xf32>
    %20 = arith.truncf %19 : vector<64x256xf32> to vector<64x256xbf16>
    %c0_8 = arith.constant 0 : index
    %c0_9 = arith.constant 0 : index
    %21 = vector.load %arg5[%c0_8, %c0_9] : memref<256x128xbf16, #tpu.memory_space<vmem>>, vector<256x128xbf16>
    %cst_10 = arith.constant dense<0.000000e+00> : vector<64x128xf32>
    %22 = tpu.matmul %20, %21, %cst_10 {dimension_numbers = #tpu.dot_dimension_numbers<[1], [0], [0], [1], [0, 0, 1, 1], [], []>} : vector<64x256xbf16>, vector<256x128xbf16>, vector<64x128xf32> -> vector<64x128xf32>
    %c0_11 = arith.constant 0 : index
    %c0_12 = arith.constant 0 : index
    %23 = vector.load %arg6[%c0_11, %c0_12] : memref<1x128xf32, #tpu.memory_space<vmem>>, vector<1x128xf32>
    %24 = vector.broadcast %23 : vector<1x128xf32> to vector<64x128xf32>
    %25 = arith.addf %22, %24 : vector<64x128xf32>
    %26 = arith.truncf %25 : vector<64x128xf32> to vector<64x128xbf16>
    %c0_13 = arith.constant 0 : index
    %c0_14 = arith.constant 0 : index
    %27 = vector.load %arg7[%c0_13, %c0_14] : memref<128x128xbf16, #tpu.memory_space<vmem>>, vector<128x128xbf16>
    %cst_15 = arith.constant dense<0.000000e+00> : vector<64x128xf32>
    %28 = tpu.matmul %26, %27, %cst_15 {dimension_numbers = #tpu.dot_dimension_numbers<[1], [0], [0], [1], [0, 0, 1, 1], [], []>} : vector<64x128xbf16>, vector<128x128xbf16>, vector<64x128xf32> -> vector<64x128xf32>
    %c0_16 = arith.constant 0 : index
    %c0_17 = arith.constant 0 : index
    %29 = vector.load %arg8[%c0_16, %c0_17] : memref<1x128xf32, #tpu.memory_space<vmem>>, vector<1x128xf32>
    %30 = vector.broadcast %29 : vector<1x128xf32> to vector<64x128xf32>
    %31 = arith.addf %28, %30 : vector<64x128xf32>
    %cst_18 = arith.constant 5.000000e-01 : f32
    %32 = vector.broadcast %cst_18 : f32 to vector<64x128xf32>
    %33 = arith.mulf %32, %31 : vector<64x128xf32>
    %cst_19 = arith.constant 4.471500e-02 : f32
    %34 = vector.broadcast %cst_19 : f32 to vector<64x128xf32>
    %35 = arith.mulf %34, %31 : vector<64x128xf32>
    %36 = arith.mulf %35, %31 : vector<64x128xf32>
    %37 = arith.mulf %36, %31 : vector<64x128xf32>
    %38 = arith.addf %31, %37 : vector<64x128xf32>
    %cst_20 = arith.constant 0.797884583 : f32
    %39 = vector.broadcast %cst_20 : f32 to vector<64x128xf32>
    %40 = arith.mulf %39, %38 : vector<64x128xf32>
    %41 = math.tanh %40 : vector<64x128xf32>
    %cst_21 = arith.constant 1.000000e+00 : f32
    %42 = vector.broadcast %cst_21 : f32 to vector<64x128xf32>
    %43 = arith.addf %42, %41 : vector<64x128xf32>
    %44 = arith.mulf %33, %43 : vector<64x128xf32>
    %c0_22 = arith.constant 0 : index
    %c0_23 = arith.constant 0 : index
    %45 = vector.load %arg3[%c0_22, %c0_23] : memref<64x128xf32, #tpu.memory_space<vmem>>, vector<64x128xf32>
    %46 = arith.addf %44, %45 : vector<64x128xf32>
    %cst_24 = arith.constant dense<0.000000e+00> : vector<64xf32>
    %47 = vector.multi_reduction <add>, %46, %cst_24 [1] : vector<64x128xf32> to vector<64xf32>
    %48 = vector.shape_cast %47 : vector<64xf32> to vector<64x1xf32>
    %cst_25 = arith.constant 1.280000e+02 : f32
    %49 = vector.broadcast %cst_25 : f32 to vector<64x1xf32>
    %50 = arith.divf %48, %49 : vector<64x1xf32>
    %51 = vector.broadcast %50 : vector<64x1xf32> to vector<64x128xf32>
    %52 = arith.subf %46, %51 : vector<64x128xf32>
    %53 = arith.mulf %52, %52 : vector<64x128xf32>
    %cst_26 = arith.constant dense<0.000000e+00> : vector<64xf32>
    %54 = vector.multi_reduction <add>, %53, %cst_26 [1] : vector<64x128xf32> to vector<64xf32>
    %55 = vector.shape_cast %54 : vector<64xf32> to vector<64x1xf32>
    %cst_27 = arith.constant 1.280000e+02 : f32
    %56 = vector.broadcast %cst_27 : f32 to vector<64x1xf32>
    %57 = arith.divf %55, %56 : vector<64x1xf32>
    %cst_28 = arith.constant 9.99999974E-6 : f32
    %58 = vector.broadcast %cst_28 : f32 to vector<64x1xf32>
    %59 = arith.addf %57, %58 : vector<64x1xf32>
    %60 = math.rsqrt %59 : vector<64x1xf32>
    %61 = vector.broadcast %60 : vector<64x1xf32> to vector<64x128xf32>
    %62 = arith.mulf %52, %61 : vector<64x128xf32>
    %c0_29 = arith.constant 0 : index
    %c0_30 = arith.constant 0 : index
    %63 = vector.load %arg9[%c0_29, %c0_30] : memref<1x128xf32, #tpu.memory_space<vmem>>, vector<1x128xf32>
    %64 = vector.broadcast %63 : vector<1x128xf32> to vector<64x128xf32>
    %65 = arith.mulf %62, %64 : vector<64x128xf32>
    %c0_31 = arith.constant 0 : index
    %c0_32 = arith.constant 0 : index
    %66 = vector.load %arg10[%c0_31, %c0_32] : memref<1x128xf32, #tpu.memory_space<vmem>>, vector<1x128xf32>
    %67 = vector.broadcast %66 : vector<1x128xf32> to vector<64x128xf32>
    %68 = arith.addf %65, %67 : vector<64x128xf32>
    %c0_33 = arith.constant 0 : index
    %c0_34 = arith.constant 0 : index
    %69 = vector.load %arg11[%c0_33, %c0_34] : memref<64x128xf32, #tpu.memory_space<vmem>>, vector<64x128xf32>
    tpu.vector_store %arg11[%c0_33, %c0_34], %68 {strides = array<i32>} : memref<64x128xf32, #tpu.memory_space<vmem>>, vector<64x128xf32>,
    return
  }
  func.func @transform_0(%arg0: i32) -> (i32, i32) {
    %c0_i32 = arith.constant 0 : i32
    %c0_i32_0 = arith.constant 0 : i32
    return %arg0, %c0_i32 : i32, i32
  }
  func.func @transform_1(%arg0: i32) -> (i32, i32) {
    %c0_i32 = arith.constant 0 : i32
    %c0_i32_0 = arith.constant 0 : i32
    return %arg0, %c0_i32 : i32, i32
  }
  func.func @transform_2(%arg0: i32) -> (i32, i32) {
    %c0_i32 = arith.constant 0 : i32
    %c0_i32_0 = arith.constant 0 : i32
    return %arg0, %c0_i32 : i32, i32
  }
  func.func @transform_3(%arg0: i32) -> (i32, i32) {
    %c0_i32 = arith.constant 0 : i32
    %c0_i32_0 = arith.constant 0 : i32
    %c0_i32_1 = arith.constant 0 : i32
    return %c0_i32, %c0_i32_0 : i32, i32
  }
  func.func @transform_4(%arg0: i32) -> (i32, i32) {
    %c0_i32 = arith.constant 0 : i32
    %c0_i32_0 = arith.constant 0 : i32
    %c0_i32_1 = arith.constant 0 : i32
    return %c0_i32, %c0_i32_0 : i32, i32
  }
  func.func @transform_5(%arg0: i32) -> (i32, i32) {
    %c0_i32 = arith.constant 0 : i32
    %c0_i32_0 = arith.constant 0 : i32
    %c0_i32_1 = arith.constant 0 : i32
    return %c0_i32, %c0_i32_0 : i32, i32
  }
  func.func @transform_6(%arg0: i32) -> (i32, i32) {
    %c0_i32 = arith.constant 0 : i32
    %c0_i32_0 = arith.constant 0 : i32
    %c0_i32_1 = arith.constant 0 : i32
    return %c0_i32, %c0_i32_0 : i32, i32
  }
  func.func @transform_7(%arg0: i32) -> (i32, i32) {
    %c0_i32 = arith.constant 0 : i32
    %c0_i32_0 = arith.constant 0 : i32
    %c0_i32_1 = arith.constant 0 : i32
    return %c0_i32, %c0_i32_0 : i32, i32
  }
  func.func @transform_8(%arg0: i32) -> (i32, i32) {
    %c0_i32 = arith.constant 0 : i32
    %c0_i32_0 = arith.constant 0 : i32
    %c0_i32_1 = arith.constant 0 : i32
    return %c0_i32, %c0_i32_0 : i32, i32
  }
  func.func @transform_9(%arg0: i32) -> (i32, i32) {
    %c0_i32 = arith.constant 0 : i32
    %c0_i32_0 = arith.constant 0 : i32
    %c0_i32_1 = arith.constant 0 : i32
    return %c0_i32, %c0_i32_0 : i32, i32
  }
  func.func @transform_10(%arg0: i32) -> (i32, i32) {
    %c0_i32 = arith.constant 0 : i32
    %c0_i32_0 = arith.constant 0 : i32
    return %arg0, %c0_i32 : i32, i32
  }
}

</mosaic_0001>

<bundles_post_ra>
// kernel: sgconv_block_forward.2
= control target key start
LH: loop header
LB: loop body
LE: loop exit
PB: predicated region body
PF: predicated region fallthrough
CT: control target
= control target key end

     0   :  { %s633_s12 = smov 0   ;;  %s746_s0 = inlined_call_operand.vmem [shape: f32[128,128], index: 0, kind: input, shape index: {}]   ;;  %s747_s1 = inlined_call_operand.vmem [shape: bf16[128,256], index: 1, kind: input, shape index: {}]   ;;  %s748_s2 = inlined_call_operand.vmem [shape: f32[1,256], index: 2, kind: input, shape index: {}]   ;;  %s749_s3 = inlined_call_operand.vmem [shape: f32[128,128], index: 3, kind: output, shape index: {}]  }
   0x1 LB: > { %s488_s13 = sadd.s32 4294967295, %s610_s12   ;;  %p492_p0 = scmp.ge.s32.totalorder %s610_s12, 1  ;;  %s610_s12 = sphi %s633_s12, %s13_s12  }
   0x2   : > { %p138_p1 = scmp.lt.s32.totalorder %s610_s12, 3 }
   0x4   : > { %p139_p2 = pnand %p492_p0, %p138_p1 }
   0x5   : > { %s493_s28 = sshll.u32 (!%p139_p2), %s488_s13, 3 }
   0x6   : > { %142 = sbr.rel (%p139_p2) target bundleno = 290 (0x122), region = 32  ;;  %p163_p3 = scmp.lt.s32.totalorder (!%p139_p2), %s493_s28, 15 }
   0xb   : > { %v548_v0 = vld [vmem:[%s747_s1 + $0x74] ss:$8 sps:$4 sm:$0xff]   ;;  %v550_v1 = vld [vmem:[%s747_s1 + $0x70] ss:$8 sps:$4 sm:$0xff]   ;;  %v612_v2 = vmov 0   ;;  %s751_s28 = smov (!%p163_p3, %s493_s28), 15  ;;  %v205_v29 = vlaneseq }
   0xc   : > { %327 = vmatprep.mubr.bf16.mxu0 %v612_v2  ;;  %347 = vmatprep.mubr.bf16.mxu1 %v612_v2  ;;  %v551_v3 = vld [vmem:[%s747_s1 + $0x64] ss:$8 sps:$4 sm:$0xff]   ;;  %v553_v4 = vld [vmem:[%s747_s1 + $0x60] ss:$8 sps:$4 sm:$0xff]   ;;  %v554_v5 = vld [vmem:[%s747_s1 + $0x54] ss:$8 sps:$4 sm:$0xff]  }
   0xd   : > { %295 = vmatprep.subr.bf16.mxu0 %v548_v0  ;;  %523 = vmatprep.subr.bf16.mxu1 %v548_v0  ;;  %v556_v6 = vld [vmem:[%s747_s1 + $0x50] ss:$8 sps:$4 sm:$0xff]   ;;  %v557_v7 = vld [vmem:[%s747_s1 + $0x44] ss:$8 sps:$4 sm:$0xff]   ;;  %v559_v8 = vld [vmem:[%s747_s1 + $0x40] ss:$8 sps:$4 sm:$0xff]  }
   0xe   : > { %296 = vmatpush1.bf16.msra.mxu0 %v550_v1  ;;  %531 = vmatpush1.bf16.msra.mxu1 %v550_v1  ;;  %v560_v9 = vld [vmem:[%s747_s1 + $0x34] ss:$8 sps:$4 sm:$0xff]   ;;  %v562_v10 = vld [vmem:[%s747_s1 + $0x30] ss:$8 sps:$4 sm:$0xff]   ;;  %v563_v11 = vld [vmem:[%s747_s1 + $0x24] ss:$8 sps:$4 sm:$0xff]  }
   0xf   : > { %297 = vmatprep.subr.bf16.mxu0 %v551_v3  ;;  %524 = vmatprep.subr.bf16.mxu1 %v551_v3  ;;  %v565_v12 = vld [vmem:[%s747_s1 + $0x20] ss:$8 sps:$4 sm:$0xff]   ;;  %v566_v13 = vld [vmem:[%s747_s1 + $0x14] ss:$8 sps:$4 sm:$0xff]   ;;  %s494_s15 = sshll.u32 %s751_s28, 3  ;;  %v206_v30 = vshrl.u32 %v205_v29, 7 }
  0x10   : > { %v568_v14 = vld [vmem:[%s747_s1 + $0x10] ss:$8 sps:$4 sm:$0xff]   ;;  %s166_s20 = scalar_lea.vmem %s746_s0, %s494_s15  ;;  %v569_v15 = vld [vmem:[%s747_s1 + $0x4] ss:$8 sps:$4 sm:$0xff]   ;;  %v571_v16 = vld [vmem:[%s747_s1] ss:$8 sps:$4 sm:$0xff]   ;;  %s726_s30 = scalar_lea.vmem %s749_s3, %s494_s15 }
  0x11   : > { %v175_v17 = vld [vmem:[%s166_s20] sm:$0xff]  ;;  %v176_v18 = vld [vmem:[%s166_s20 + $0x8] sm:$0xff]  ;;  %v177_v23 = vld [vmem:[%s166_s20 + $0x10] sm:$0xff]  ;;  %v211_v31 = vsub.s32 1, %v206_v30 }
  0x12   : > { %298 = vmatpush1.bf16.msra.mxu0 %v553_v4  ;;  %532 = vmatpush1.bf16.msra.mxu1 %v553_v4  ;;  %v179_v19 = vld [vmem:[%s166_s20 + $0x20] sm:$0xff]  ;;  %v180_v20 = vld [vmem:[%s166_s20 + $0x28] sm:$0xff]  ;;  %v183_v21 = vpack.c.bf16 %v176_v18, %v175_v17  ;;  %v178_v24 = vld [vmem:[%s166_s20 + $0x18] sm:$0xff] }
  0x13   : > { %299 = vmatprep.subr.bf16.mxu0 %v554_v5  ;;  %525 = vmatprep.subr.bf16.mxu1 %v554_v5  ;;  %v185_v22 = vpack.c.bf16 %v180_v20, %v179_v19  ;;  %v181_v25 = vld [vmem:[%s166_s20 + $0x30] sm:$0xff]  ;;  %v182_v26 = vld [vmem:[%s166_s20 + $0x38] sm:$0xff]  ;;  %v184_v27 = vpack.c.bf16 %v178_v24, %v177_v23  ;;  %v203_v32 = vld [vmem:[%s748_s2] sm:$0x3] }
  0x14   : > { %v186_v28 = vpack.c.bf16 %v182_v26, %v181_v25  ;;  %v212_v33 = vrot.slane %v203_v32, %v211_v31 }
  0x16   : > { %300 = vmatpush1.bf16.msra.mxu0 %v556_v6  ;;  %533 = vmatpush1.bf16.msra.mxu1 %v556_v6 }
  0x17   : > { %301 = vmatprep.subr.bf16.mxu0 %v557_v7  ;;  %526 = vmatprep.subr.bf16.mxu1 %v557_v7 }
  0x1a   : > { %302 = vmatpush1.bf16.msra.mxu0 %v559_v8  ;;  %534 = vmatpush1.bf16.msra.mxu1 %v559_v8 }
  0x1b   : > { %303 = vmatprep.subr.bf16.mxu0 %v560_v9  ;;  %527 = vmatprep.subr.bf16.mxu1 %v560_v9 }
  0x1e   : > { %304 = vmatpush1.bf16.msra.mxu0 %v562_v10  ;;  %535 = vmatpush1.bf16.msra.mxu1 %v562_v10  ;;  %v207_v10 = vsub.s32 0, %v206_v30 }
  0x1f   : > { %305 = vmatprep.subr.bf16.mxu0 %v563_v11  ;;  %528 = vmatprep.subr.bf16.mxu1 %v563_v11 }
  0x22   : > { %306 = vmatpush1.bf16.msra.mxu0 %v565_v12  ;;  %536 = vmatpush1.bf16.msra.mxu1 %v565_v12 }
  0x23   : > { %307 = vmatprep.subr.bf16.mxu0 %v566_v13  ;;  %529 = vmatprep.subr.bf16.mxu1 %v566_v13 }
  0x26   : > { %308 = vmatpush1.bf16.msra.mxu0 %v568_v14  ;;  %537 = vmatpush1.bf16.msra.mxu1 %v568_v14 }
  0x27   : > { %309 = vmatprep.subr.bf16.mxu0 %v569_v15  ;;  %530 = vmatprep.subr.bf16.mxu1 %v569_v15  ;;  %v208_v15 = vrot.slane %v203_v32, %v207_v10 }
  0x2a   : > { %310 = vmatpush1.bf16.msra.mxu0 %v571_v16  ;;  %538 = vmatpush1.bf16.msra.mxu1 %v571_v16 }
  0x2d   : > { %328 = vmatmul.mubr.bf16.vlgmr.msra.gmra.mxu0 %v183_v21  ;;  %348 = vmatmul.mubr.bf16.vlgmr.msra.gmra.mxu1 %v185_v22 }
  0x2e   : > { %337 = vmatprep.mubr.bf16.mxu0 %v612_v2  ;;  %357 = vmatprep.mubr.bf16.mxu1 %v612_v2 }
  0x35   : > { %338 = vmatmul.mubr.bf16.gmra.mxu0 %v184_v27  ;;  %358 = vmatmul.mubr.bf16.gmra.mxu1 %v186_v28 }
  0xed   : > { %v704_v34 = vpop.f32.mrf.mxu0  ;;  %v706_v35 = vpop.f32.mrf.mxu1 }
  0xee   : > { %v330_v20 = vadd.f32 %v704_v34, %v208_v15  ;;  %v350_v22 = vadd.f32 %v706_v35, %v208_v15 }
  0xef   : > { %v331_v36 = vpop.f32.mrf.mxu0  ;;  %v351_v37 = vpop.f32.mrf.mxu1 }
  0xf0   : > { %v332_v38 = vadd.f32 %v331_v36, %v212_v33  ;;  %v352_v39 = vadd.f32 %v351_v37, %v212_v33 }
  0xf1   : > { %v708_v40 = vpop.f32.mrf.mxu0  ;;  %v710_v41 = vpop.f32.mrf.mxu1 }
  0xf2   : > { %v513_v42 = vmul.f32 -1.442695, %v332_v38  ;;  %v517_v43 = vmul.f32 -1.442695, %v352_v39  ;;  %v334_v26 = vadd.f32 %v708_v40, %v208_v15  ;;  %v354_v28 = vadd.f32 %v710_v41, %v208_v15 }
  0xf3   : > { %v335_v44 = vpop.f32.mrf.mxu0  ;;  %v355_v45 = vpop.f32.mrf.mxu1 }
  0xf4   : > { %572 = vpow2.f32 %v513_v42  ;;  %v336_v46 = vadd.f32 %v335_v44, %v212_v33  ;;  %v356_v47 = vadd.f32 %v355_v45, %v212_v33 }
  0xf5   : > { %574 = vpow2.f32 %v517_v43  ;;  %v712_v48 = vpop.f32.mrf.mxu0  ;;  %v714_v49 = vpop.f32.mrf.mxu1 }
  0xf6   : > { %v514_v50 = vmul.f32 -1.442695, %v336_v46  ;;  %v518_v51 = vmul.f32 -1.442695, %v356_v47  ;;  %v340_v32 = vadd.f32 %v712_v48, %v208_v15  ;;  %v360_v34 = vadd.f32 %v714_v49, %v208_v15 }
  0xf7   : > { %v341_v52 = vpop.f32.mrf.mxu0  ;;  %v361_v53 = vpop.f32.mrf.mxu1 }
  0xf8   : > { %576 = vpow2.f32 %v514_v50  ;;  %v342_v54 = vadd.f32 %v341_v52, %v212_v33  ;;  %v362_v55 = vadd.f32 %v361_v53, %v212_v33 }
  0xf9   : > { %578 = vpow2.f32 %v518_v51  ;;  %v716_v56 = vpop.f32.mrf.mxu0  ;;  %v718_v57 = vpop.f32.mrf.mxu1 }
  0xfa   : > { %v515_v58 = vmul.f32 -1.442695, %v342_v54  ;;  %v519_v59 = vmul.f32 -1.442695, %v362_v55  ;;  %v344_v38 = vadd.f32 %v716_v56, %v208_v15  ;;  %v364_v40 = vadd.f32 %v718_v57, %v208_v15 }
  0xfb   : > { %v345_v60 = vpop.f32.mrf.mxu0  ;;  %v365_v61 = vpop.f32.mrf.mxu1 }
  0xfc   : > { %580 = vpow2.f32 %v515_v58  ;;  %v346_v62 = vadd.f32 %v345_v60, %v212_v33  ;;  %v366_v63 = vadd.f32 %v365_v61, %v212_v33 }
  0xfd   : > { %582 = vpow2.f32 %v519_v59 }
  0xfe   : > { %v516_v0 = vmul.f32 -1.442695, %v346_v62  ;;  %v520_v1 = vmul.f32 -1.442695, %v366_v63 }
 0x100   : > { %584 = vpow2.f32 %v516_v0 }
 0x101   : > { %v573_v2 = vpop.eup %572  ;;  %586 = vpow2.f32 %v520_v1 }
 0x102   : > { %v575_v3 = vpop.eup %574  ;;  %v392_v4 = vadd.f32 1.0, %v573_v2 }
 0x103   : > { %v396_v5 = vadd.f32 1.0, %v575_v3 }
 0x104   : > { %588 = vrcp.f32 %v392_v4 }
 0x105   : > { %v577_v6 = vpop.eup %576  ;;  %590 = vrcp.f32 %v396_v5 }
 0x106   : > { %v579_v7 = vpop.eup %578  ;;  %v393_v8 = vadd.f32 1.0, %v577_v6 }
 0x107   : > { %v397_v9 = vadd.f32 1.0, %v579_v7 }
 0x108   : > { %592 = vrcp.f32 %v393_v8 }
 0x109   : > { %v581_v11 = vpop.eup %580  ;;  %594 = vrcp.f32 %v397_v9 }
 0x10a   : > { %v583_v12 = vpop.eup %582  ;;  %v394_v13 = vadd.f32 1.0, %v581_v11 }
 0x10b   : > { %v398_v14 = vadd.f32 1.0, %v583_v12 }
 0x10c   : > { %596 = vrcp.f32 %v394_v13 }
 0x10d   : > { %v585_v16 = vpop.eup %584  ;;  %598 = vrcp.f32 %v398_v14 }
 0x10e   : > { %v587_v17 = vpop.eup %586  ;;  %v395_v18 = vadd.f32 1.0, %v585_v16 }
 0x10f   : > { %v399_v19 = vadd.f32 1.0, %v587_v17 }
 0x110   : > { %600 = vrcp.f32 %v395_v18 }
 0x111   : > { %v589_v21 = vpop.eup %588  ;;  %602 = vrcp.f32 %v399_v19 }
 0x112   : > { %v591_v23 = vpop.eup %590  ;;  %v416_v24 = vmul.f32 %v589_v21, %v330_v20 }
 0x113   : > { %v420_v25 = vmul.f32 %v591_v23, %v350_v22 }
 0x114   : > { %424 = vst [vmem:[%s726_s30] sm:$0xff] %v416_v24 }
 0x115   : > { %v593_v27 = vpop.eup %592  ;;  %428 = vst [vmem:[%s726_s30 + $0x20] sm:$0xff] %v420_v25 }
 0x116   : > { %v595_v29 = vpop.eup %594  ;;  %v417_v30 = vmul.f32 %v593_v27, %v334_v26 }
 0x117   : > { %v421_v31 = vmul.f32 %v595_v29, %v354_v28 }
 0x118   : > { %425 = vst [vmem:[%s726_s30 + $0x8] sm:$0xff] %v417_v30 }
 0x119   : > { %v597_v33 = vpop.eup %596  ;;  %429 = vst [vmem:[%s726_s30 + $0x28] sm:$0xff] %v421_v31 }
 0x11a   : > { %v599_v35 = vpop.eup %598  ;;  %v418_v36 = vmul.f32 %v597_v33, %v340_v32 }
 0x11b   : > { %v422_v37 = vmul.f32 %v599_v35, %v360_v34 }
 0x11c   : > { %426 = vst [vmem:[%s726_s30 + $0x10] sm:$0xff] %v418_v36 }
 0x11d   : > { %v601_v39 = vpop.eup %600  ;;  %430 = vst [vmem:[%s726_s30 + $0x30] sm:$0xff] %v422_v37 }
 0x11e   : > { %v603_v41 = vpop.eup %602  ;;  %v419_v42 = vmul.f32 %v601_v39, %v344_v38 }
 0x11f   : > { %v423_v43 = vmul.f32 %v603_v41, %v364_v40 }
 0x120   : > { %427 = vst [vmem:[%s726_s30 + $0x18] sm:$0xff] %v419_v42 }
 0x121   : > { %431 = vst [vmem:[%s726_s30 + $0x38] sm:$0xff] %v423_v43 }
 0x122 PF: > { %s13_s12 = sadd.s32 1, %s610_s12  }
 0x123   : > { %p10_p4 = scmp.ge.s32.totalorder %s13_s12, 4  }
 0x125   :  { %12 = sbr.rel (!%p10_p4) target bundleno = 1 (0x1), region = 62 }

// kernel: reverse.0
= control target key start
LH: loop header
LB: loop body
LE: loop exit
PB: predicated region body
PF: predicated region fallthrough
CT: control target
= control target key end

     0   :  { %v2_v0 = vlaneseq  ;;  %s687_s0 = inlined_call_operand.vmem [shape: f32[2,2,128,63], index: 0, kind: input, shape index: {}]   ;;  %s688_s1 = inlined_call_operand.vmem [shape: f32[2,2,128,63], index: 1, kind: output, shape index: {}]  }
   0x2   :  { %v583_v1 = vsub.s32 62, %v2_v0 }
   0x4   :  { %4 = vset.pattern.permute.xlu0 %v583_v1 }
   0x5   :  { %s586_s6 = smov 0   ;;  %s588_s7 = smov 0  }
   0x6   :  { %s590_s8 = smov 0   ;;  %s592_s9 = smov 0  }
   0x7   :  { %s594_s10 = smov 0  }
   0x8 LB: > { %s446_s11 = sadd.s32 4294967295, %s571_s10   ;;  %s32_s12 = sadd.s32 1, %s563_s8  ;;  %s571_s10 = sphi %s594_s10, %s10_s10   ;;  %s567_s9 = sphi %s592_s9, %s692_s9   ;;  %s563_s8 = sphi %s590_s8, %s691_s8   ;;  %s559_s7 = sphi %s588_s7, %s690_s7   ;;  %s555_s6 = sphi %s586_s6, %s689_s6  }
   0x9   : > { %p34_p0 = scmp.ge.s32.totalorder %s32_s12, 2  ;;  %s36_s13 = sadd.s32 1, %s567_s9 }
   0xa   : > { %p448_p2 = scmp.ge.s32.totalorder %s571_s10, 4 }
   0xb   : > { %s694_s12 = smov (%p34_p0, %s32_s12), 0  ;;  %s696_s13 = smov (!%p34_p0, %s36_s13), %s567_s9 }
   0xc   : > { %p38_p1 = scmp.ge.s32.totalorder %s696_s13, 2  ;;  %50 = sbr.rel (%p448_p2) target bundleno = 28 (0x1c), region = 16 }
   0xd   : > { %s52_s14 = sand.u32 (!%p448_p2), 1, %s571_s10   ;;  %s450_s15 = sshll.u32 (!%p448_p2), %s563_s8, 4 }
   0xe   : > { %s698_s13 = smov (%p38_p1, %s696_s13), 0  ;;  %s449_s16 = sshll.u32 (!%p448_p2), %s52_s14, 7 }
   0xf   : > { %s451_s17 = sshll.u32 (!%p448_p2), %s567_s9, 5  ;;  %s54_s23 = scalar_lea.vmem (!%p448_p2), [#allocation0], %s449_s16 }
  0x10   : > { %s61_s18 = sadd.s32 (!%p448_p2), %s451_s17, %s450_s15 }
  0x11   : > { %s452_s19 = sshll.u32 %s61_s18, 3 }
  0x12   : > { %s626_s22 = scalar_lea.vmem %s687_s0, %s452_s19 }
  0x13   : > { %v122_v2 = vld [vmem:[%s626_s22] sm:$0xff]  ;;  %v124_v3 = vld [vmem:[%s626_s22 + $0x8] sm:$0xff]  ;;  %v126_v4 = vld [vmem:[%s626_s22 + $0x10] sm:$0xff] }
  0x14   : > { %123 = vst [vmem:[%s54_s23] sm:$0xff] %v122_v2  ;;  %125 = vst [vmem:[%s54_s23 + $0x8] sm:$0xff] %v124_v3  ;;  %v128_v5 = vld [vmem:[%s626_s22 + $0x18] sm:$0xff]  ;;  %v130_v6 = vld [vmem:[%s626_s22 + $0x20] sm:$0xff] }
  0x15   : > { %127 = vst [vmem:[%s54_s23 + $0x10] sm:$0xff] %v126_v4  ;;  %v132_v7 = vld [vmem:[%s626_s22 + $0x28] sm:$0xff]  ;;  %129 = vst [vmem:[%s54_s23 + $0x18] sm:$0xff] %v128_v5  ;;  %v134_v8 = vld [vmem:[%s626_s22 + $0x30] sm:$0xff] }
  0x16   : > { %131 = vst [vmem:[%s54_s23 + $0x20] sm:$0xff] %v130_v6  ;;  %133 = vst [vmem:[%s54_s23 + $0x28] sm:$0xff] %v132_v7  ;;  %v136_v9 = vld [vmem:[%s626_s22 + $0x38] sm:$0xff]  ;;  %v138_v10 = vld [vmem:[%s626_s22 + $0x40] sm:$0xff] }
  0x17   : > { %135 = vst [vmem:[%s54_s23 + $0x30] sm:$0xff] %v134_v8  ;;  %137 = vst [vmem:[%s54_s23 + $0x38] sm:$0xff] %v136_v9  ;;  %v140_v11 = vld [vmem:[%s626_s22 + $0x48] sm:$0xff]  ;;  %v142_v12 = vld [vmem:[%s626_s22 + $0x50] sm:$0xff] }
  0x18   : > { %139 = vst [vmem:[%s54_s23 + $0x40] sm:$0xff] %v138_v10  ;;  %v144_v13 = vld [vmem:[%s626_s22 + $0x58] sm:$0xff]  ;;  %141 = vst [vmem:[%s54_s23 + $0x48] sm:$0xff] %v140_v11  ;;  %v146_v14 = vld [vmem:[%s626_s22 + $0x60] sm:$0xff] }
  0x19   : > { %143 = vst [vmem:[%s54_s23 + $0x50] sm:$0xff] %v142_v12  ;;  %145 = vst [vmem:[%s54_s23 + $0x58] sm:$0xff] %v144_v13  ;;  %v148_v15 = vld [vmem:[%s626_s22 + $0x68] sm:$0xff]  ;;  %v150_v16 = vld [vmem:[%s626_s22 + $0x70] sm:$0xff] }
  0x1a   : > { %147 = vst [vmem:[%s54_s23 + $0x60] sm:$0xff] %v146_v14  ;;  %149 = vst [vmem:[%s54_s23 + $0x68] sm:$0xff] %v148_v15  ;;  %v152_v17 = vld [vmem:[%s626_s22 + $0x78] sm:$0xff] }
  0x1b   : > { %151 = vst [vmem:[%s54_s23 + $0x70] sm:$0xff] %v150_v16  ;;  %153 = vst [vmem:[%s54_s23 + $0x78] sm:$0xff] %v152_v17 }
  0x1c PF: > { %p453_p3 = scmp.ge.s32.totalorder %s571_s10, 1  ;;  %p158_p4 = scmp.lt.s32.totalorder %s571_s10, 5 }
  0x1e   : > { %p159_p5 = pnand %p453_p3, %p158_p4 }
  0x1f   : > { %s165_s24 = sand.u32 (!%p159_p5), 1, %s446_s11   ;;  %s487_s27 = sshll.u32 (!%p159_p5), %s555_s6, 4 }
  0x20   : > { %162 = sbr.rel (%p159_p5) target bundleno = 191 (0xbf), region = 54  ;;  %s454_s25 = sshll.u32 (!%p159_p5), %s165_s24, 7 }
  0x21   : > { %s167_s26 = scalar_lea.vmem (!%p159_p5), [#allocation0], %s454_s25  ;;  %s488_s28 = sshll.u32 (!%p159_p5), %s559_s7, 5 }
  0x22   : > { %s282_s29 = sadd.s32 (!%p159_p5), %s488_s28, %s487_s27 }
  0x23   : > { %s489_s30 = sshll.u32 (!%p159_p5), %s282_s29, 3 }
  0x24   : > { %s654_s4 = scalar_lea.vmem (!%p159_p5), %s688_s1, %s489_s30 }
  0x25   : > { %532 = vset.pattern.permute.xlu1 %v583_v1  ;;  %v458_v18 = vld [vmem:[%s167_s26 + $0x10] sm:$0xff]  ;;  %v179_v19 = vld [vmem:[%s167_s26] sm:$0xff]  ;;  %v460_v20 = vld [vmem:[%s167_s26 + $0x18] sm:$0xff] }
  0x26   : > { %192 = vperm.xlu1 %532, %v458_v18   ;;  %180 = vperm.xlu0 %4, %v179_v19   ;;  %v456_v21 = vld [vmem:[%s167_s26 + $0x8] sm:$0xff]  ;;  %v462_v23 = vld [vmem:[%s167_s26 + $0x20] sm:$0xff]  ;;  %v468_v24 = vld [vmem:[%s167_s26 + $0x38] sm:$0xff] }
  0x27   : > { %v464_v22 = vld [vmem:[%s167_s26 + $0x28] sm:$0xff]  ;;  %v466_v25 = vld [vmem:[%s167_s26 + $0x30] sm:$0xff]  ;;  %v470_v27 = vld [vmem:[%s167_s26 + $0x40] sm:$0xff] }
  0x28   : > { %v472_v26 = vld [vmem:[%s167_s26 + $0x48] sm:$0xff]  ;;  %v476_v28 = vld [vmem:[%s167_s26 + $0x58] sm:$0xff]  ;;  %v474_v29 = vld [vmem:[%s167_s26 + $0x50] sm:$0xff] }
  0x29   : > { %v480_v30 = vld [vmem:[%s167_s26 + $0x68] sm:$0xff]  ;;  %v478_v31 = vld [vmem:[%s167_s26 + $0x60] sm:$0xff]  ;;  %v484_v32 = vld [vmem:[%s167_s26 + $0x78] sm:$0xff] }
  0x2a   : > { %198 = vperm.xlu1 %532, %v460_v20   ;;  %186 = vperm.xlu0 %4, %v456_v21   ;;  %v482_v33 = vld [vmem:[%s167_s26 + $0x70] sm:$0xff] }
  0x2e   : > { %210 = vperm.xlu1 %532, %v464_v22   ;;  %204 = vperm.xlu0 %4, %v462_v23  }
  0x32   : > { %222 = vperm.xlu1 %532, %v468_v24   ;;  %216 = vperm.xlu0 %4, %v466_v25  }
  0x36   : > { %234 = vperm.xlu1 %532, %v472_v26   ;;  %228 = vperm.xlu0 %4, %v470_v27  }
  0x3a   : > { %246 = vperm.xlu1 %532, %v476_v28   ;;  %240 = vperm.xlu0 %4, %v474_v29  }
  0x3e   : > { %258 = vperm.xlu1 %532, %v480_v30   ;;  %252 = vperm.xlu0 %4, %v478_v31  }
  0x42   : > { %270 = vperm.xlu1 %532, %v484_v32   ;;  %264 = vperm.xlu0 %4, %v482_v33  }
  0xa1   : > { %v193_v34 = vpop.permute.xlu1 %192  ;;  %v181_v35 = vpop.permute.xlu0 %180 }
  0xa2   : > { %348 = vst [vmem:[%s654_s4 + $0x10] sm:$0xff] %v193_v34  ;;  %344 = vst [vmem:[%s654_s4] sm:$0xff] %v181_v35 }
  0xa5   : > { %v199_v36 = vpop.permute.xlu1 %198  ;;  %v187_v37 = vpop.permute.xlu0 %186 }
  0xa6   : > { %350 = vst [vmem:[%s654_s4 + $0x18] sm:$0xff] %v199_v36  ;;  %346 = vst [vmem:[%s654_s4 + $0x8] sm:$0xff] %v187_v37 }
  0xa9   : > { %v211_v38 = vpop.permute.xlu1 %210  ;;  %v205_v39 = vpop.permute.xlu0 %204 }
  0xaa   : > { %354 = vst [vmem:[%s654_s4 + $0x28] sm:$0xff] %v211_v38  ;;  %352 = vst [vmem:[%s654_s4 + $0x20] sm:$0xff] %v205_v39 }
  0xad   : > { %v223_v40 = vpop.permute.xlu1 %222  ;;  %v217_v41 = vpop.permute.xlu0 %216 }
  0xae   : > { %358 = vst [vmem:[%s654_s4 + $0x38] sm:$0xff] %v223_v40  ;;  %356 = vst [vmem:[%s654_s4 + $0x30] sm:$0xff] %v217_v41 }
  0xb1   : > { %v235_v42 = vpop.permute.xlu1 %234  ;;  %v229_v43 = vpop.permute.xlu0 %228 }
  0xb2   : > { %362 = vst [vmem:[%s654_s4 + $0x48] sm:$0xff] %v235_v42  ;;  %360 = vst [vmem:[%s654_s4 + $0x40] sm:$0xff] %v229_v43 }
  0xb5   : > { %v247_v44 = vpop.permute.xlu1 %246  ;;  %v241_v45 = vpop.permute.xlu0 %240 }
  0xb6   : > { %366 = vst [vmem:[%s654_s4 + $0x58] sm:$0xff] %v247_v44  ;;  %364 = vst [vmem:[%s654_s4 + $0x50] sm:$0xff] %v241_v45 }
  0xb9   : > { %v259_v46 = vpop.permute.xlu1 %258  ;;  %v253_v47 = vpop.permute.xlu0 %252 }
  0xba   : > { %370 = vst [vmem:[%s654_s4 + $0x68] sm:$0xff] %v259_v46  ;;  %368 = vst [vmem:[%s654_s4 + $0x60] sm:$0xff] %v253_v47 }
  0xbd   : > { %v271_v48 = vpop.permute.xlu1 %270  ;;  %v265_v49 = vpop.permute.xlu0 %264 }
  0xbe   : > { %374 = vst [vmem:[%s654_s4 + $0x78] sm:$0xff] %v271_v48  ;;  %372 = vst [vmem:[%s654_s4 + $0x70] sm:$0xff] %v265_v49 }
  0xbf PF: > { %s10_s10 = sadd.s32 1, %s571_s10   ;;  %s689_s6 = smov %s563_s8 }
  0xc0   : > { %p7_p6 = scmp.ge.s32.totalorder %s10_s10, 6   ;;  %s690_s7 = smov %s567_s9 }
  0xc1   : > { %s691_s8 = smov %s694_s12  ;;  %s692_s9 = smov %s698_s13 }
  0xc2   :  { %9 = sbr.rel (!%p7_p6) target bundleno = 8 (0x8), region = 148 }

// kernel: sgconv_block_forward.3
= control target key start
LH: loop header
LB: loop body
LE: loop exit
PB: predicated region body
PF: predicated region fallthrough
CT: control target
= control target key end

     0   :  { %15 = vsyncpa [#allocation3], 0  ;;  %s2083_s0 = inlined_call_operand.vmem [shape: f32[128,256], index: 0, kind: input, shape index: {}]   ;;  %s2084_s1 = inlined_call_operand.vmem [shape: f32[128,128], index: 1, kind: input, shape index: {}]   ;;  %s2085_s2 = inlined_call_operand.vmem [shape: f32[128,128], index: 2, kind: input, shape index: {}]   ;;  %s2086_s3 = inlined_call_operand.vmem [shape: f32[1,256], index: 3, kind: input, shape index: {}]   ;;  %s2087_s4 = inlined_call_operand.vmem [shape: bf16[256,128], index: 4, kind: input, shape index: {}]   ;;  %s2088_s5 = inlined_call_operand.vmem [shape: f32[1,128], index: 5, kind: input, shape index: {}]   ;;  %s2089_s6 = inlined_call_operand.vmem [shape: bf16[128,128], index: 6, kind: input, shape index: {}]   ;;  %s2090_s7 = inlined_call_operand.vmem [shape: f32[1,128], index: 7, kind: input, shape index: {}]   ;;  %s2091_s8 = inlined_call_operand.vmem [shape: f32[1,128], index: 8, kind: input, shape index: {}]   ;;  %s2092_s9 = inlined_call_operand.vmem [shape: f32[1,128], index: 9, kind: input, shape index: {}]   ;;  %s2093_s10 = inlined_call_operand.hbm [shape: f32[128,128], index: 10, kind: output, shape index: {}]  }
   0x1   :  { %17 = vsyncpa [#allocation3 + $0x1], 0  ;;  %s1656_s13 = smov 0   ;;  %s1658_s14 = smov 0  }
   0x2   :  { %s1660_s15 = smov 0   ;;  %s1662_s16 = smov 0  }
   0x3 LB: > { %s1677_s17 = sadd.s32 4294967295, %s1596_s16   ;;  %s1284_s18 = sadd.s32 4294967294, %s1596_s16   ;;  %s1596_s16 = sphi %s1662_s16, %s2101_s16   ;;  %s1592_s15 = sphi %s1660_s15, %s2100_s15   ;;  %s1588_s14 = sphi %s1658_s14, %s2099_s14   ;;  %s1584_s13 = sphi %s1656_s13, %s2098_s13  }
   0x4   : > { %s1681_s19 = sadd.s32 1, %s1596_s16   ;;  %s255_s20 = sadd.s32 1, %s1592_s15 }
   0x5   : > { %s252_s21 = ssub.s32 %s1596_s16, %s1681_s19  ;;  %p265_p0 = scmp.ne.s32.totalorder %s1592_s15, %s1588_s14 }
   0x6   : > { %p253_p1 = scmp.eq.s32.totalorder %s252_s21, 0  ;;  %p266_p2 = scmp.eq.s32.totalorder %s1677_s17, 1 }
   0x7   : > { %p271_p3 = scmp.ne.s32.totalorder %s1588_s14, %s1584_s13  ;;  %p272_p4 = scmp.eq.s32.totalorder %s1284_s18, 1 }
   0x8   : > { %s1692_s22 = scalar_select %p253_p1, %s1592_s15, %s255_s20  }
   0x9   : > { %p1694_p5 = por %p266_p2, %p265_p0  ;;  %p1698_p6 = por %p272_p4, %p271_p3 }
   0xa   : > { %2094 = sst [smem:[#allocation5_spill]] %s1692_s22  ;;  %p1287_p7 = scmp.ge.s32.totalorder %s1596_s16, 1 }
   0xb   : > { %p339_p8 = scmp.lt.s32.totalorder %s1596_s16, 3 }
   0xd   : > { %p340_p9 = pnand %p1287_p7, %p339_p8 }
   0xe   : > { %s1289_s27 = sshll.u32 (!%p340_p9), %s1677_s17, 3  ;;  %s1598_s25 = smov (!%p340_p9), [#allocation2]  }
   0xf   : > { %343 = sbr.rel (%p340_p9) target bundleno = 852 (0x354), region = 60  ;;  %p389_p10 = scmp.lt.s32.totalorder (!%p340_p9), %s1289_s27, 15 }
  0x14   : > { %v1448_v0 = vld [vmem:[%s2087_s4 + $0x78] sm:$0xff]   ;;  %v1450_v2 = vld [vmem:[%s2087_s4 + $0x70] sm:$0xff]   ;;  %v1452_v4 = vld [vmem:[%s2087_s4 + $0x68] sm:$0xff]   ;;  %v419_v5 = vlaneseq  ;;  %s2103_s27 = smov (!%p389_p10, %s1289_s27), 15 }
  0x15   : > { %v1449_v1 = vld [vmem:[%s2087_s4 + $0x38] sm:$0xff]   ;;  %1331 = vmatprep.subr.bf16.mxu0 %v1448_v0  ;;  %v1451_v3 = vld [vmem:[%s2087_s4 + $0x30] sm:$0xff]   ;;  %v1453_v6 = vld [vmem:[%s2087_s4 + $0x28] sm:$0xff]   ;;  %s1293_s30 = sshll.u32 %s2103_s27, 3  ;;  %s1329_s18 = sshll.u32 %s2103_s27, 4 }
  0x16   : > { %1332 = vmatpush3.bf16.msra.mxu0 %v1449_v1  ;;  %v1454_v7 = vld [vmem:[%s2087_s4 + $0x60] sm:$0xff]   ;;  %v420_v8 = vshrl.u32 %v419_v5, 7  ;;  %v1456_v10 = vld [vmem:[%s2087_s4 + $0x58] sm:$0xff]   ;;  %s1741_s22 = scalar_lea.vmem %s2084_s1, %s1293_s30  ;;  %s1749_s20 = scalar_lea.vmem %s2083_s0, %s1329_s18  ;;  %v1458_v14 = vld [vmem:[%s2087_s4 + $0x50] sm:$0xff]  }
  0x17   : > { %1333 = vmatprep.subr.bf16.mxu0 %v1450_v2  ;;  %v1455_v9 = vld [vmem:[%s2087_s4 + $0x20] sm:$0xff]   ;;  %v1457_v13 = vld [vmem:[%s2087_s4 + $0x18] sm:$0xff]   ;;  %v410_v16 = vld [vmem:[%s1741_s22 + $0x8] sm:$0xff]  ;;  %s1968_s21 = scalar_lea.vmem %s2085_s2, %s1293_s30  ;;  %s385_s27 = sand.u32 1, %s1588_s14  }
  0x18   : > { %v421_v11 = vsub.s32 0, %v420_v8  ;;  %v425_v12 = vsub.s32 1, %v420_v8  ;;  %v409_v15 = vld [vmem:[%s1741_s22] sm:$0xff]  ;;  %v446_v20 = vld [vmem:[%s1749_s20 + $0x8] sm:$0xff]  ;;  %v448_v21 = vld [vmem:[%s1749_s20 + $0x18] sm:$0xff]  ;;  %s1288_s26 = sshll.u32 %s385_s27, 6 }
  0x19   : > { %v417_v17 = vld [vmem:[%s2086_s3] sm:$0x3]  ;;  %v447_v23 = vld [vmem:[%s1749_s20 + $0x10] sm:$0xff]  ;;  %v412_v25 = vld [vmem:[%s1741_s22 + $0x18] sm:$0xff]  ;;  %s1330_s18 = sshll.u32 %s1677_s17, 10  ;;  %s2043_s30 = scalar_lea.sflag [#allocation3], %s385_s27 }
  0x1a   : > { %1334 = vmatpush3.bf16.msra.mxu0 %v1451_v3  ;;  %v1759_v18 = vrot.slane %v417_v17, %v421_v11  ;;  %v1761_v19 = vrot.slane %v417_v17, %v425_v12  ;;  %v445_v22 = vld [vmem:[%s1749_s20] sm:$0xff]  ;;  %v411_v24 = vld [vmem:[%s1741_s22 + $0x10] sm:$0xff]  ;;  %v450_v31 = vld [vmem:[%s1749_s20 + $0x28] sm:$0xff] }
  0x1b   : > { %1335 = vmatprep.subr.bf16.mxu0 %v1452_v4  ;;  %v1459_v26 = vld [vmem:[%s2087_s4 + $0x10] sm:$0xff]   ;;  %v452_v32 = vld [vmem:[%s1749_s20 + $0x38] sm:$0xff]  ;;  %v1460_v33 = vld [vmem:[%s2087_s4 + $0x48] sm:$0xff]  }
  0x1c   : > { %v429_v27 = vmul.f32 %v1759_v18, %v409_v15  ;;  %v430_v28 = vmul.f32 %v1761_v19, %v409_v15  ;;  %v431_v29 = vmul.f32 %v1759_v18, %v410_v16  ;;  %v432_v30 = vmul.f32 %v1761_v19, %v410_v16  ;;  %v449_v44 = vld [vmem:[%s1749_s20 + $0x20] sm:$0xff]  ;;  %v451_v45 = vld [vmem:[%s1749_s20 + $0x30] sm:$0xff]  ;;  %v1461_v46 = vld [vmem:[%s2087_s4 + $0x8] sm:$0xff]  }
  0x1d   : > { %v434_v34 = vmul.f32 %v1761_v19, %v411_v24  ;;  %v436_v35 = vmul.f32 %v1761_v19, %v412_v25  ;;  %v433_v36 = vmul.f32 %v1759_v18, %v411_v24  ;;  %v435_v37 = vmul.f32 %v1759_v18, %v412_v25  ;;  %v1462_v49 = vld [vmem:[%s2087_s4 + $0x40] sm:$0xff]   ;;  %v1464_v60 = vld [vmem:[%s2089_s6 + $0x38] sm:$0xff]   ;;  %v414_v11 = vld [vmem:[%s1741_s22 + $0x28] sm:$0xff] }
  0x1e   : > { %1336 = vmatpush3.bf16.msra.mxu0 %v1453_v6  ;;  %v462_v38 = vadd.f32 %v446_v20, %v430_v28  ;;  %v1785_v39 = vadd.f32 %v448_v21, %v432_v30  ;;  %v1787_v40 = vadd.f32 %v445_v22, %v429_v27  ;;  %v1789_v41 = vadd.f32 %v447_v23, %v431_v29  ;;  %v1463_v61 = vld [vmem:[%s2087_s4] sm:$0xff]   ;;  %v1465_v6 = vld [vmem:[%s2089_s6 + $0x30] sm:$0xff]   ;;  %v454_v16 = vld [vmem:[%s1749_s20 + $0x48] sm:$0xff] }
  0x1f   : > { %1337 = vmatprep.subr.bf16.mxu0 %v1454_v7  ;;  %v1791_v42 = vadd.f32 %v450_v31, %v434_v34  ;;  %v1793_v43 = vadd.f32 %v452_v32, %v436_v35  ;;  %v1807_v54 = vadd.f32 %v449_v44, %v433_v36  ;;  %v1809_v55 = vadd.f32 %v451_v45, %v435_v37  ;;  %v413_v5 = vld [vmem:[%s1741_s22 + $0x20] sm:$0xff]  ;;  %v1466_v17 = vld [vmem:[%s2089_s6 + $0x28] sm:$0xff]   ;;  %v456_v24 = vld [vmem:[%s1749_s20 + $0x58] sm:$0xff] }
  0x20   : > { %v494_v47 = vmul.f32 0.044715, %v462_v38  ;;  %v496_v48 = vmul.f32 0.044715, %v1785_v39  ;;  %v493_v50 = vmul.f32 0.044715, %v1787_v40  ;;  %1383 = vmatprep.subr.bf16.mxu1 %v1464_v60  ;;  %v438_v31 = vmul.f32 %v1761_v19, %v413_v5 }
  0x21   : > { %v495_v51 = vmul.f32 0.044715, %v1789_v41  ;;  %v498_v58 = vmul.f32 0.044715, %v1791_v42  ;;  %v500_v59 = vmul.f32 0.044715, %v1793_v43  ;;  %1384 = vmatpush3.bf16.msra.mxu1 %v1464_v60  ;;  %v440_v34 = vmul.f32 %v1761_v19, %v414_v11 }
  0x22   : > { %1338 = vmatpush3.bf16.msra.mxu0 %v1455_v9  ;;  %v510_v52 = vmul.f32 %v494_v47, %v462_v38  ;;  %v512_v53 = vmul.f32 %v496_v48, %v1785_v39  ;;  %v509_v56 = vmul.f32 %v493_v50, %v1787_v40  ;;  %v1821_v62 = vmul.f32 0.5, %v462_v38  ;;  %1385 = vmatprep.subr.bf16.mxu1 %v1465_v6  ;;  %v455_v47 = vld [vmem:[%s1749_s20 + $0x50] sm:$0xff]  ;;  %v458_v60 = vld [vmem:[%s1749_s20 + $0x68] sm:$0xff] }
  0x23   : > { %1339 = vmatprep.subr.bf16.mxu0 %v1456_v10  ;;  %v511_v57 = vmul.f32 %v495_v51, %v1789_v41  ;;  %v514_v3 = vmul.f32 %v498_v58, %v1791_v42  ;;  %v516_v4 = vmul.f32 %v500_v59, %v1793_v43  ;;  %v497_v9 = vmul.f32 0.044715, %v1807_v54  ;;  %v415_v48 = vld [vmem:[%s1741_s22 + $0x30] sm:$0xff] }
  0x24   : > { %v526_v63 = vmul.f32 %v510_v52, %v462_v38  ;;  %v528_v0 = vmul.f32 %v512_v53, %v1785_v39  ;;  %v525_v1 = vmul.f32 %v509_v56, %v1787_v40  ;;  %v499_v10 = vmul.f32 0.044715, %v1809_v55  ;;  %v416_v52 = vld [vmem:[%s1741_s22 + $0x38] sm:$0xff] }
  0x25   : > { %v527_v2 = vmul.f32 %v511_v57, %v1789_v41  ;;  %v532_v15 = vmul.f32 %v516_v4, %v1793_v43  ;;  %v513_v22 = vmul.f32 %v497_v9, %v1807_v54  ;;  %1386 = vmatpush3.bf16.msra.mxu1 %v1465_v6  ;;  %v1855_v37 = vadd.f32 %v454_v16, %v438_v31 }
  0x26   : > { %1340 = vmatpush3.bf16.msra.mxu0 %v1457_v13  ;;  %v542_v7 = vadd.f32 %v526_v63, %v462_v38  ;;  %v544_v8 = vadd.f32 %v528_v0, %v1785_v39  ;;  %v541_v12 = vadd.f32 %v525_v1, %v1787_v40  ;;  %v515_v23 = vmul.f32 %v499_v10, %v1809_v55  ;;  %v457_v10 = vld [vmem:[%s1749_s20 + $0x60] sm:$0xff] }
  0x27   : > { %1341 = vmatprep.subr.bf16.mxu0 %v1458_v14  ;;  %v543_v13 = vadd.f32 %v527_v2, %v1789_v41  ;;  %v530_v14 = vmul.f32 %v514_v3, %v1791_v42  ;;  %v548_v28 = vadd.f32 %v532_v15, %v1793_v43  ;;  %v529_v29 = vmul.f32 %v513_v22, %v1807_v54 }
  0x28   : > { %v558_v20 = vmul.f32 0.7978846, %v542_v7  ;;  %v560_v21 = vmul.f32 0.7978846, %v544_v8  ;;  %v557_v25 = vmul.f32 0.7978846, %v541_v12  ;;  %v531_v30 = vmul.f32 %v515_v23, %v1809_v55  ;;  %1387 = vmatprep.subr.bf16.mxu1 %v1466_v17 }
  0x29   : > { %v546_v27 = vadd.f32 %v530_v14, %v1791_v42  ;;  %v545_v35 = vadd.f32 %v529_v29, %v1807_v54  ;;  %v1857_v38 = vadd.f32 %v456_v24, %v440_v34  ;;  %v437_v44 = vmul.f32 %v1759_v18, %v413_v5  ;;  %1388 = vmatpush3.bf16.msra.mxu1 %v1466_v17 }
  0x2a   : > { %1342 = vmatpush3.bf16.msra.mxu0 %v1459_v26  ;;  %v559_v26 = vmul.f32 0.7978846, %v543_v13  ;;  %1472 = vtanh.f32 %v558_v20  ;;  %v547_v36 = vadd.f32 %v531_v30, %v1809_v55  ;;  %v439_v45 = vmul.f32 %v1759_v18, %v414_v11  ;;  %v459_v20 = vld [vmem:[%s1749_s20 + $0x70] sm:$0xff] }
  0x2b   : > { %1343 = vmatprep.subr.bf16.mxu0 %v1460_v33  ;;  %1474 = vtanh.f32 %v560_v21  ;;  %v562_v32 = vmul.f32 0.7978846, %v546_v27  ;;  %v564_v33 = vmul.f32 0.7978846, %v548_v28  ;;  %v561_v50 = vmul.f32 0.7978846, %v545_v35 }
  0x2c   : > { %1476 = vtanh.f32 %v557_v25  ;;  %v563_v51 = vmul.f32 0.7978846, %v547_v36  ;;  %v1869_v53 = vmul.f32 0.5, %v1787_v40  ;;  %v502_v56 = vmul.f32 0.044715, %v1855_v37 }
  0x2d   : > { %1478 = vtanh.f32 %v559_v26  ;;  %v504_v57 = vmul.f32 0.044715, %v1857_v38  ;;  %v1875_v59 = vadd.f32 %v455_v47, %v439_v45  ;;  %v444_v0 = vmul.f32 %v1761_v19, %v416_v52 }
  0x2e   : > { %1344 = vmatpush3.bf16.msra.mxu0 %v1461_v46  ;;  %v453_v46 = vld [vmem:[%s1749_s20 + $0x40] sm:$0xff]  ;;  %1480 = vtanh.f32 %v562_v32  ;;  %v518_v40 = vmul.f32 %v502_v56, %v1855_v37  ;;  %v479_v1 = vmul.f32 0.5, %v1789_v41  ;;  %v482_v2 = vmul.f32 0.5, %v1791_v42 }
  0x2f   : > { %1345 = vmatprep.subr.bf16.mxu0 %v1462_v49  ;;  %v1865_v49 = vmul.f32 0.5, %v1785_v39  ;;  %1482 = vtanh.f32 %v564_v33  ;;  %v1873_v58 = vadd.f32 %v453_v46, %v437_v44  ;;  %v442_v39 = vmul.f32 %v1761_v19, %v415_v48 }
  0x30   : > { %1484 = vtanh.f32 %v561_v50  ;;  %v520_v63 = vmul.f32 %v504_v57, %v1857_v38  ;;  %v503_v4 = vmul.f32 0.044715, %v1875_v59  ;;  %v534_v5 = vmul.f32 %v518_v40, %v1855_v37 }
  0x31   : > { %1486 = vtanh.f32 %v563_v51  ;;  %v501_v3 = vmul.f32 0.044715, %v1873_v58  ;;  %v1889_v7 = vadd.f32 %v458_v60, %v442_v39  ;;  %v484_v9 = vmul.f32 0.5, %v1793_v43 }
  0x32   : > { %1346 = vmatpush3.bf16.msra.mxu0 %v1463_v61  ;;  %v460_v61 = vld [vmem:[%s1749_s20 + $0x78] sm:$0xff]  ;;  %v536_v6 = vmul.f32 %v520_v63, %v1857_v38  ;;  %v519_v41 = vmul.f32 %v503_v4, %v1875_v59  ;;  %v441_v42 = vmul.f32 %v1759_v18, %v415_v48  ;;  %v481_v11 = vmul.f32 0.5, %v1807_v54  ;;  %s2018_s20 = scalar_lea.vmem [#allocation2], %s1288_s26  ;;  %s1540_s26 = sshll.u32 %s1598_s25, 4  ;;  %s1541_s26 = int_to_ptr.vmem [resolvable:$false] %s1540_s26 }
  0x33   : > { %v1891_v8 = vadd.f32 %v460_v61, %v444_v0  ;;  %v517_v19 = vmul.f32 %v501_v3, %v1873_v58  ;;  %v550_v12 = vadd.f32 %v534_v5, %v1855_v37  ;;  %v443_v14 = vmul.f32 %v1759_v18, %v416_v52  ;;  %s1198_s29 = sshll.u32 %s2018_s20, 4  ;;  %s1542_s28 = scalar_lea.vmem %s1541_s26, 2048  ;;  %s2038_s29 = int_to_ptr.vmem [resolvable:$true] %s1198_s29 }
  0x34   : > { %v552_v13 = vadd.f32 %v536_v6, %v1857_v38  ;;  %v535_v16 = vmul.f32 %v519_v41, %v1875_v59  ;;  %v506_v43 = vmul.f32 0.044715, %v1889_v7  ;;  %v483_v22 = vmul.f32 0.5, %v1809_v55  ;;  %s1536_s17 = scalar_lea.vmem %s2038_s29, 1024  ;;  %p1543_p0 = scmp.lt.s32.totalorder %s2038_s29, %s1541_s26 }
  0x35   : > { %v533_v15 = vmul.f32 %v517_v19, %v1873_v58  ;;  %v508_v17 = vmul.f32 0.044715, %v1891_v8  ;;  %v566_v23 = vmul.f32 0.7978846, %v550_v12  ;;  %v1908_v24 = vadd.f32 %v457_v10, %v441_v42  ;;  %p1537_p11 = scmp.ne.s32.totalorder %s2038_s29, %s1536_s17  ;;  %p1544_p1 = scmp.lt.s32.totalorder %s1542_s28, %s1536_s17 }
  0x36   : > { %v568_v54 = vmul.f32 0.7978846, %v552_v13  ;;  %v551_v27 = vadd.f32 %v535_v16, %v1875_v59  ;;  %v522_v28 = vmul.f32 %v506_v43, %v1889_v7  ;;  %v1914_v32 = vadd.f32 %v459_v20, %v443_v14 }
  0x37   : > { %v1473_v21 = vpop.eup %1472  ;;  %v549_v18 = vadd.f32 %v533_v15, %v1873_v58  ;;  %1488 = vtanh.f32 %v566_v23  ;;  %v524_v31 = vmul.f32 %v508_v17, %v1891_v8  ;;  %v505_v6 = vmul.f32 0.044715, %v1908_v24  ;;  %p1538_p12 = pnand %p1537_p11, %p1694_p5  ;;  %p1545_p2 = por %p1544_p1, %p1543_p0 }
  0x38   : > { %v1475_v25 = vpop.eup %1474  ;;  %v590_v26 = vadd.f32 1.0, %v1473_v21  ;;  %1490 = vtanh.f32 %v568_v54  ;;  %v567_v46 = vmul.f32 0.7978846, %v551_v27  ;;  %v538_v47 = vmul.f32 %v522_v28, %v1889_v7 }
  0x39   : > { %v1477_v29 = vpop.eup %1476  ;;  %v592_v30 = vadd.f32 1.0, %v1475_v25  ;;  %v565_v35 = vmul.f32 0.7978846, %v549_v18  ;;  %v540_v52 = vmul.f32 %v524_v31, %v1891_v8  ;;  %v507_v42 = vmul.f32 0.044715, %v1914_v32  ;;  %p1539_p13 = pneg %p1538_p12 }
  0x3a   : > { %v1479_v55 = vpop.eup %1478  ;;  %v606_v33 = vmul.f32 %v590_v26, %v1821_v62  ;;  %v589_v34 = vadd.f32 1.0, %v1477_v29  ;;  %v486_v13 = vmul.f32 0.5, %v1855_v37  ;;  %v487_v37 = vmul.f32 0.5, %v1875_v59 }
  0x3b   : > { %v1481_v36 = vpop.eup %1480  ;;  %v608_v44 = vmul.f32 %v592_v30, %v1865_v49  ;;  %v591_v45 = vadd.f32 1.0, %v1479_v55  ;;  %1492 = vtanh.f32 %v565_v35  ;;  %v554_v49 = vadd.f32 %v538_v47, %v1889_v7  ;;  %p1546_p3 = pnand %p1545_p2, %p1539_p13 }
  0x3c   : > { %v1483_v48 = vpop.eup %1482  ;;  %v605_v50 = vmul.f32 %v589_v34, %v1869_v53  ;;  %v594_v51 = vadd.f32 1.0, %v1481_v36  ;;  %1494 = vtanh.f32 %v567_v46  ;;  %v556_v63 = vadd.f32 %v540_v52, %v1891_v8 }
  0x3d   : > { %v1485_v56 = vpop.eup %1484  ;;  %v622_v57 = vpack.c.bf16 %v608_v44, %v606_v33  ;;  %v607_v62 = vmul.f32 %v591_v45, %v479_v1  ;;  %v596_v39 = vadd.f32 1.0, %v1483_v48  ;;  %v570_v4 = vmul.f32 0.7978846, %v554_v49 }
  0x3e   : > { %v1487_v60 = vpop.eup %1486  ;;  %v610_v61 = vmul.f32 %v594_v51, %v482_v2  ;;  %v593_v40 = vadd.f32 1.0, %v1485_v56  ;;  %v572_v5 = vmul.f32 0.7978846, %v556_v63  ;;  %v521_v2 = vmul.f32 %v505_v6, %v1908_v24 }
  0x3f   : > { %796 = vmatprep.mubr.bf16.mxu0 %v622_v57  ;;  %v621_v0 = vpack.c.bf16 %v607_v62, %v605_v50  ;;  %v612_v3 = vmul.f32 %v596_v39, %v484_v9  ;;  %v595_v53 = vadd.f32 1.0, %v1487_v60  ;;  %1496 = vtanh.f32 %v570_v4  ;;  %v1470_v39 = vld [vmem:[%s2089_s6 + $0x8] sm:$0xff]   ;;  %v1471_v60 = vld [vmem:[%s2089_s6] sm:$0xff]  }
  0x40   : > { %v609_v1 = vmul.f32 %v593_v40, %v481_v11  ;;  %1498 = vtanh.f32 %v572_v5  ;;  %v523_v10 = vmul.f32 %v507_v42, %v1914_v32  ;;  %v537_v9 = vmul.f32 %v521_v2, %v1908_v24 }
  0x41   : > { %797 = vmatmul.mubr.bf16.vlgmr.msra.gmra.mxu0 %v621_v0  ;;  %v624_v19 = vpack.c.bf16 %v612_v3, %v610_v61  ;;  %v611_v41 = vmul.f32 %v595_v53, %v483_v22  ;;  %v488_v11 = vmul.f32 0.5, %v1857_v38  ;;  %v485_v22 = vmul.f32 0.5, %v1873_v58  ;;  %v1296_v3 = vld [vmem:[%s2088_s5] ss:$0 sm:$0xff] }
  0x42   : > { %v539_v14 = vmul.f32 %v523_v10, %v1914_v32  ;;  %v553_v16 = vadd.f32 %v537_v9, %v1908_v24  ;;  %v490_v55 = vmul.f32 0.5, %v1889_v7  ;;  %v492_v34 = vmul.f32 0.5, %v1891_v8  ;;  %v1467_v8 = vld [vmem:[%s2089_s6 + $0x20] sm:$0xff]  }
  0x43   : > { %804 = vmatprep.mubr.bf16.mxu0 %v624_v19  ;;  %v623_v12 = vpack.c.bf16 %v611_v41, %v609_v1  ;;  %v489_v47 = vmul.f32 0.5, %v1908_v24  ;;  %v491_v50 = vmul.f32 0.5, %v1914_v32  ;;  %1389 = vmatprep.subr.bf16.mxu1 %v1467_v8  ;;  %v1468_v24 = vld [vmem:[%s2089_s6 + $0x18] sm:$0xff]  }
  0x44   : > { %v1489_v15 = vpop.eup %1488  ;;  %v555_v20 = vadd.f32 %v539_v14, %v1914_v32  ;;  %v569_v23 = vmul.f32 0.7978846, %v553_v16  ;;  %1390 = vmatpush3.bf16.msra.mxu1 %v1467_v8  ;;  %v1469_v32 = vld [vmem:[%s2089_s6 + $0x10] sm:$0xff]  }
  0x45   : > { %v1491_v43 = vpop.eup %1490  ;;  %v598_v17 = vadd.f32 1.0, %v1489_v15  ;;  %1391 = vmatprep.subr.bf16.mxu1 %v1468_v24 }
  0x46   : > { %v600_v21 = vadd.f32 1.0, %v1491_v43  ;;  %v571_v26 = vmul.f32 0.7978846, %v555_v20  ;;  %1500 = vtanh.f32 %v569_v23 }
  0x47   : > { %v614_v25 = vmul.f32 %v598_v17, %v486_v13 }
  0x48   : > { %v1493_v54 = vpop.eup %1492  ;;  %v616_v27 = vmul.f32 %v600_v21, %v488_v11  ;;  %1502 = vtanh.f32 %v571_v26  ;;  %1392 = vmatpush3.bf16.msra.mxu1 %v1468_v24 }
  0x49   : > { %805 = vmatmul.mubr.bf16.gmra.mxu0 %v623_v12  ;;  %v1495_v18 = vpop.eup %1494  ;;  %v597_v28 = vadd.f32 1.0, %v1493_v54  ;;  %1393 = vmatprep.subr.bf16.mxu1 %v1469_v32 }
  0x4a   : > { %v599_v38 = vadd.f32 1.0, %v1495_v18  ;;  %v626_v29 = vpack.c.bf16 %v616_v27, %v614_v25 }
  0x4b   : > { %v613_v30 = vmul.f32 %v597_v28, %v485_v22 }
  0x4c   : > { %v615_v31 = vmul.f32 %v599_v38, %v487_v37  ;;  %812 = vmatprep.mubr.bf16.mxu0 %v626_v29  ;;  %v1497_v58 = vpop.eup %1496  ;;  %1394 = vmatpush3.bf16.msra.mxu1 %v1469_v32  ;;  %v1313_v29 = vld [vmem:[%s2090_s7] ss:$0 sm:$0xff] }
  0x4d   : > { %v1499_v35 = vpop.eup %1498  ;;  %v602_v36 = vadd.f32 1.0, %v1497_v58  ;;  %1395 = vmatprep.subr.bf16.mxu1 %v1470_v39 }
  0x4e   : > { %v625_v33 = vpack.c.bf16 %v615_v31, %v613_v30  ;;  %v604_v59 = vadd.f32 1.0, %v1499_v35 }
  0x4f   : > { %v618_v44 = vmul.f32 %v602_v36, %v490_v55 }
  0x50   : > { %v620_v45 = vmul.f32 %v604_v59, %v492_v34  ;;  %1396 = vmatpush3.bf16.msra.mxu1 %v1470_v39 }
  0x51   : > { %813 = vmatmul.mubr.bf16.gmra.mxu0 %v625_v33  ;;  %1397 = vmatprep.subr.bf16.mxu1 %v1471_v60 }
  0x52   : > { %v628_v46 = vpack.c.bf16 %v620_v45, %v618_v44 }
  0x53   : > { %v1501_v48 = vpop.eup %1500 }
  0x54   : > { %820 = vmatprep.mubr.bf16.mxu0 %v628_v46  ;;  %v601_v52 = vadd.f32 1.0, %v1501_v48  ;;  %1398 = vmatpush3.bf16.msra.mxu1 %v1471_v60 }
  0x55   : > { %v1503_v51 = vpop.eup %1502 }
  0x56   : > { %v603_v7 = vadd.f32 1.0, %v1503_v51  ;;  %v617_v56 = vmul.f32 %v601_v52, %v489_v47 }
  0x58   : > { %v619_v57 = vmul.f32 %v603_v7, %v491_v50 }
  0x5a   : > { %v627_v62 = vpack.c.bf16 %v619_v57, %v617_v56 }
  0x5c   : > { %821 = vmatmul.mubr.bf16.gmra.mxu0 %v627_v62 }
 0x101   : > { %v1347_v61 = vpop.f32.mrf.mxu0 }
 0x103   : > { %v1348_v40 = vpop.f32.mrf.mxu0 }
 0x104   : > { %v1349_v63 = vadd.f32 %v1348_v40, %v1347_v61 }
 0x105   : > { %v1350_v49 = vpop.f32.mrf.mxu0 }
 0x106   : > { %v799_v5 = vadd.f32 %v1349_v63, %v1296_v3 }
 0x107   : > { %v1351_v0 = vpop.f32.mrf.mxu0 }
 0x108   : > { %v1352_v53 = vadd.f32 %v1351_v0, %v1350_v49 }
 0x109   : > { %v1353_v4 = vpop.f32.mrf.mxu0 }
 0x10a   : > { %v802_v6 = vadd.f32 %v1352_v53, %v1296_v3 }
 0x10b   : > { %v1354_v19 = vpop.f32.mrf.mxu0 }
 0x10c   : > { %v829_v1 = vpack.c.bf16 %v802_v6, %v799_v5  ;;  %v1355_v42 = vadd.f32 %v1354_v19, %v1353_v4 }
 0x10d   : > { %v1356_v41 = vpop.f32.mrf.mxu0 }
 0x10e   : > { %1399 = vmatprep.mubr.bf16.mxu1 %v829_v1  ;;  %v807_v12 = vadd.f32 %v1355_v42, %v1296_v3 }
 0x10f   : > { %v1357_v2 = vpop.f32.mrf.mxu0 }
 0x110   : > { %v1358_v10 = vadd.f32 %v1357_v2, %v1356_v41 }
 0x111   : > { %v1359_v9 = vpop.f32.mrf.mxu0 }
 0x112   : > { %v810_v13 = vadd.f32 %v1358_v10, %v1296_v3 }
 0x113   : > { %v1360_v14 = vpop.f32.mrf.mxu0 }
 0x114   : > { %v830_v15 = vpack.c.bf16 %v810_v13, %v807_v12  ;;  %v1361_v16 = vadd.f32 %v1360_v14, %v1359_v9  ;;  %v1043_v9 = vld [vmem:[%s1968_s21 + $0x10] sm:$0xff] }
 0x115   : > { %v1362_v11 = vpop.f32.mrf.mxu0 }
 0x116   : > { %1400 = vmatmul.mubr.bf16.vlgmr.msra.gmra.mxu1 %v830_v15  ;;  %v815_v20 = vadd.f32 %v1361_v16, %v1296_v3 }
 0x117   : > { %v1363_v43 = vpop.f32.mrf.mxu0 }
 0x118   : > { %v1364_v17 = vadd.f32 %v1363_v43, %v1362_v11 }
 0x11a   : > { %v818_v21 = vadd.f32 %v1364_v17, %v1296_v3 }
 0x11c   : > { %v831_v22 = vpack.c.bf16 %v818_v21, %v815_v20  ;;  %v1365_v23 = vpop.f32.mrf.mxu0 }
 0x11e   : > { %1403 = vmatprep.mubr.bf16.mxu1 %v831_v22  ;;  %v1366_v54 = vpop.f32.mrf.mxu0 }
 0x11f   : > { %v1367_v37 = vadd.f32 %v1366_v54, %v1365_v23  ;;  %v1041_v54 = vld [vmem:[%s1968_s21] sm:$0xff] }
 0x120   : > { %v1368_v25 = vpop.f32.mrf.mxu0 }
 0x121   : > { %v823_v27 = vadd.f32 %v1367_v37, %v1296_v3 }
 0x122   : > { %v1369_v26 = vpop.f32.mrf.mxu0 }
 0x123   : > { %v1370_v18 = vadd.f32 %v1369_v26, %v1368_v25 }
 0x125   : > { %v826_v28 = vadd.f32 %v1370_v18, %v1296_v3  ;;  %v1044_v18 = vld [vmem:[%s1968_s21 + $0x18] sm:$0xff] }
 0x127   : > { %v832_v38 = vpack.c.bf16 %v826_v28, %v823_v27 }
 0x129   : > { %1404 = vmatmul.mubr.bf16.gmra.mxu1 %v832_v38 }
 0x1d6   : > { %v1401_v30 = vpop.f32.mrf.mxu1 }
 0x1d7   : > { %v947_v31 = vadd.f32 %v1401_v30, %v1313_v29 }
 0x1d8   : > { %v938_v55 = vpop.f32.mrf.mxu1 }
 0x1d9   : > { %v979_v58 = vmul.f32 0.044715, %v947_v31  ;;  %v939_v33 = vadd.f32 %v1313_v29, %v938_v55  ;;  %v971_v6 = vmul.f32 0.5, %v947_v31 }
 0x1da   : > { %v1402_v34 = vpop.f32.mrf.mxu1 }
 0x1db   : > { %v987_v35 = vmul.f32 %v979_v58, %v947_v31  ;;  %v977_v36 = vmul.f32 0.044715, %v939_v33  ;;  %v950_v59 = vadd.f32 %v1402_v34, %v1313_v29  ;;  %v969_v16 = vmul.f32 0.5, %v939_v33 }
 0x1dc   : > { %v941_v44 = vpop.f32.mrf.mxu1 }
 0x1dd   : > { %v985_v45 = vmul.f32 %v977_v36, %v939_v33  ;;  %v980_v46 = vmul.f32 0.044715, %v950_v59  ;;  %v942_v47 = vadd.f32 %v1313_v29, %v941_v44  ;;  %v995_v48 = vmul.f32 %v987_v35, %v947_v31 }
 0x1de   : > { %v972_v17 = vmul.f32 0.5, %v950_v59 }
 0x1df   : > { %v988_v50 = vmul.f32 %v980_v46, %v950_v59  ;;  %v978_v51 = vmul.f32 0.044715, %v942_v47  ;;  %v1003_v52 = vadd.f32 %v995_v48, %v947_v31  ;;  %v993_v7 = vmul.f32 %v985_v45, %v939_v33 }
 0x1e0   : > { %v970_v27 = vmul.f32 0.5, %v942_v47 }
 0x1e1   : > { %v986_v56 = vmul.f32 %v978_v51, %v942_v47  ;;  %v1011_v57 = vmul.f32 0.7978846, %v1003_v52  ;;  %v1001_v62 = vadd.f32 %v993_v7, %v939_v33  ;;  %v996_v8 = vmul.f32 %v988_v50, %v950_v59  ;;  %v1042_v33 = vld [vmem:[%s1968_s21 + $0x8] sm:$0xff] }
 0x1e3   : > { %1504 = vtanh.f32 %v1011_v57  ;;  %v1009_v24 = vmul.f32 0.7978846, %v1001_v62  ;;  %v1004_v32 = vadd.f32 %v996_v8, %v950_v59  ;;  %v994_v39 = vmul.f32 %v986_v56, %v942_v47 }
 0x1e5   : > { %1506 = vtanh.f32 %v1009_v24  ;;  %v1012_v60 = vmul.f32 0.7978846, %v1004_v32  ;;  %v1002_v61 = vadd.f32 %v994_v39, %v942_v47  ;;  %v1045_v24 = vld [vmem:[%s1968_s21 + $0x20] sm:$0xff] }
 0x1e7   : > { %1508 = vtanh.f32 %v1012_v60  ;;  %v1010_v40 = vmul.f32 0.7978846, %v1002_v61 }
 0x1e9   : > { %1510 = vtanh.f32 %v1010_v40  ;;  %v1405_v49 = vpop.f32.mrf.mxu1 }
 0x1ea   : > { %v1960_v63 = vadd.f32 %v1405_v49, %v1313_v29 }
 0x1eb   : > { %v954_v0 = vpop.f32.mrf.mxu1 }
 0x1ec   : > { %v983_v3 = vmul.f32 0.044715, %v1960_v63  ;;  %v955_v53 = vadd.f32 %v1313_v29, %v954_v0  ;;  %v975_v60 = vmul.f32 0.5, %v1960_v63 }
 0x1ed   : > { %v1406_v5 = vpop.f32.mrf.mxu1 }
 0x1ee   : > { %v991_v19 = vmul.f32 %v983_v3, %v1960_v63  ;;  %v981_v1 = vmul.f32 0.044715, %v955_v53  ;;  %v1971_v41 = vadd.f32 %v1406_v5, %v1313_v29  ;;  %v973_v57 = vmul.f32 0.5, %v955_v53  ;;  %v1046_v3 = vld [vmem:[%s1968_s21 + $0x28] sm:$0xff] }
 0x1ef   : > { %v957_v10 = vpop.f32.mrf.mxu1 }
 0x1f0   : > { %v1505_v4 = vpop.eup %1504  ;;  %v989_v12 = vmul.f32 %v981_v1, %v955_v53  ;;  %v984_v13 = vmul.f32 0.044715, %v1971_v41  ;;  %v958_v14 = vadd.f32 %v1313_v29, %v957_v10  ;;  %v999_v20 = vmul.f32 %v991_v19, %v1960_v63 }
 0x1f1   : > { %v1027_v42 = vadd.f32 1.0, %v1505_v4  ;;  %v976_v19 = vmul.f32 0.5, %v1971_v41 }
 0x1f2   : > { %v1507_v2 = vpop.eup %1506  ;;  %v992_v21 = vmul.f32 %v984_v13, %v1971_v41  ;;  %v982_v22 = vmul.f32 0.044715, %v958_v14  ;;  %v997_v28 = vmul.f32 %v989_v12, %v955_v53  ;;  %v1007_v38 = vadd.f32 %v999_v20, %v1960_v63 }
 0x1f3   : > { %v1035_v15 = vmul.f32 %v1027_v42, %v971_v6  ;;  %v1025_v43 = vadd.f32 1.0, %v1507_v2  ;;  %v974_v61 = vmul.f32 0.5, %v958_v14  ;;  %v1047_v6 = vld [vmem:[%s1968_s21 + $0x30] sm:$0xff]  ;;  %v1048_v2 = vld [vmem:[%s1968_s21 + $0x38] sm:$0xff]  ;;  %s2036_s21 = scalar_lea.hbm %s2093_s10, %s1330_s18 }
 0x1f4   : > { %v1509_v11 = vpop.eup %1508  ;;  %v990_v29 = vmul.f32 %v982_v22, %v958_v14  ;;  %v1000_v55 = vmul.f32 %v992_v21, %v1971_v41  ;;  %v1005_v34 = vadd.f32 %v997_v28, %v955_v53  ;;  %v1015_v35 = vmul.f32 0.7978846, %v1007_v38 }
 0x1f5   : > { %v1977_v23 = vadd.f32 %v1043_v9, %v1035_v15  ;;  %v1028_v25 = vadd.f32 1.0, %v1509_v11  ;;  %v1033_v26 = vmul.f32 %v1025_v43, %v969_v16 }
 0x1f6   : > { %v1511_v37 = vpop.eup %1510  ;;  %v998_v44 = vmul.f32 %v990_v29, %v958_v14  ;;  %v1008_v45 = vadd.f32 %v1000_v55, %v1971_v41  ;;  %v1013_v46 = vmul.f32 0.7978846, %v1005_v34  ;;  %1512 = vtanh.f32 %v1015_v35 }
 0x1f7   : > { %1061 = vadd.xlane.f32.xlu1 %v1977_v23  ;;  %v1036_v30 = vmul.f32 %v1028_v25, %v972_v17  ;;  %v1026_v31 = vadd.f32 1.0, %v1511_v37  ;;  %v1049_v58 = vadd.f32 %v1041_v54, %v1033_v26 }
 0x1f8   : > { %v1006_v48 = vadd.f32 %v998_v44, %v958_v14  ;;  %v1016_v50 = vmul.f32 0.7978846, %v1008_v45  ;;  %1514 = vtanh.f32 %v1013_v46 }
 0x1f9   : > { %v1052_v36 = vadd.f32 %v1044_v18, %v1036_v30  ;;  %v1034_v59 = vmul.f32 %v1026_v31, %v970_v27  ;;  %1057 = vadd.xlane.f32.xlu0 %v1049_v58 }
 0x1fa   : > { %v1014_v51 = vmul.f32 0.7978846, %v1006_v48  ;;  %1516 = vtanh.f32 %v1016_v50 }
 0x1fb   : > { %1063 = vadd.xlane.f32.xlu1 %v1052_v36  ;;  %v1050_v47 = vadd.f32 %v1042_v33, %v1034_v59 }
 0x1fc   : > { %1518 = vtanh.f32 %v1014_v51 }
 0x1fd   : > { %1059 = vadd.xlane.f32.xlu0 %v1050_v47 }
 0x203   : > { %v1513_v52 = vpop.eup %1512 }
 0x204   : > { %v1031_v8 = vadd.f32 1.0, %v1513_v52 }
 0x205   : > { %v1515_v7 = vpop.eup %1514 }
 0x206   : > { %v1029_v62 = vadd.f32 1.0, %v1515_v7  ;;  %v1039_v4 = vmul.f32 %v1031_v8, %v975_v60  ;;  %v1322_v8 = vld [vmem:[%s2091_s8] ss:$0 sm:$0xff] }
 0x207   : > { %v1517_v56 = vpop.eup %1516 }
 0x208   : > { %v1037_v39 = vmul.f32 %v1029_v62, %v973_v57  ;;  %v1032_v49 = vadd.f32 1.0, %v1517_v56  ;;  %v1055_v42 = vadd.f32 %v1047_v6, %v1039_v4 }
 0x209   : > { %v1519_v32 = vpop.eup %1518 }
 0x20a   : > { %v1030_v40 = vadd.f32 1.0, %v1519_v32  ;;  %v1053_v0 = vadd.f32 %v1045_v24, %v1037_v39  ;;  %v1040_v1 = vmul.f32 %v1032_v49, %v976_v19  ;;  %v1323_v32 = vld [vmem:[%s2092_s9] ss:$0 sm:$0xff] }
 0x20c   : > { %v1038_v5 = vmul.f32 %v1030_v40, %v974_v61  ;;  %1065 = vadd.xlane.f32.xlu0 %v1053_v0  ;;  %v1056_v10 = vadd.f32 %v1048_v2, %v1040_v1 }
 0x20e   : > { %v1054_v53 = vadd.f32 %v1046_v3, %v1038_v5 }
 0x210   : > { %1067 = vadd.xlane.f32.xlu1 %v1054_v53  ;;  %1069 = vadd.xlane.f32.xlu0 %v1055_v42 }
 0x214   : > { %1071 = vadd.xlane.f32.xlu1 %v1056_v10 }
 0x280   : > { %v1062_v63 = vpop.xlane.xlu1 %1061 }
 0x281   : > { %v1076_v9 = vmul.f32 0.0078125, %v1062_v63 }
 0x282   : > { %v1058_v13 = vpop.xlane.xlu0 %1057 }
 0x283   : > { %v1084_v12 = vsub.f32 %v1977_v23, %v1076_v9  ;;  %v1074_v14 = vmul.f32 0.0078125, %v1058_v13 }
 0x284   : > { %v1064_v15 = vpop.xlane.xlu1 %1063 }
 0x285   : > { %v1077_v11 = vmul.f32 0.0078125, %v1064_v15  ;;  %v1092_v16 = vmul.f32 %v1084_v12, %v1084_v12  ;;  %v1082_v43 = vsub.f32 %v1049_v58, %v1074_v14 }
 0x286   : > { %v1060_v17 = vpop.xlane.xlu0 %1059 }
 0x287   : > { %v1085_v41 = vsub.f32 %v1052_v36, %v1077_v11  ;;  %1102 = vadd.xlane.f32.xlu0 %v1092_v16  ;;  %v1075_v20 = vmul.f32 0.0078125, %v1060_v17  ;;  %v1090_v22 = vmul.f32 %v1082_v43, %v1082_v43 }
 0x289   : > { %v1093_v21 = vmul.f32 %v1085_v41, %v1085_v41  ;;  %v1083_v54 = vsub.f32 %v1050_v47, %v1075_v20 }
 0x28b   : > { %1104 = vadd.xlane.f32.xlu1 %v1093_v21  ;;  %1098 = vadd.xlane.f32.xlu0 %v1090_v22  ;;  %v1091_v25 = vmul.f32 %v1083_v54, %v1083_v54 }
 0x28f   : > { %1100 = vadd.xlane.f32.xlu1 %v1091_v25 }
 0x295   : > { %v1066_v37 = vpop.xlane.xlu0 %1065 }
 0x296   : > { %v1078_v26 = vmul.f32 0.0078125, %v1066_v37 }
 0x298   : > { %v1993_v23 = vsub.f32 %v1053_v0, %v1078_v26 }
 0x299   : > { %v1068_v18 = vpop.xlane.xlu1 %1067  ;;  %v1070_v28 = vpop.xlane.xlu0 %1069 }
 0x29a   : > { %v1079_v27 = vmul.f32 0.0078125, %v1068_v18  ;;  %v1080_v38 = vmul.f32 0.0078125, %v1070_v28  ;;  %v1094_v29 = vmul.f32 %v1993_v23, %v1993_v23 }
 0x29c   : > { %v1997_v30 = vsub.f32 %v1054_v53, %v1079_v27  ;;  %v1999_v31 = vsub.f32 %v1055_v42, %v1080_v38  ;;  %1106 = vadd.xlane.f32.xlu0 %v1094_v29 }
 0x29d   : > { %v1072_v55 = vpop.xlane.xlu1 %1071 }
 0x29e   : > { %v1081_v58 = vmul.f32 0.0078125, %v1072_v55  ;;  %v1095_v33 = vmul.f32 %v1997_v30, %v1997_v30  ;;  %v1096_v34 = vmul.f32 %v1999_v31, %v1999_v31 }
 0x2a0   : > { %v2005_v35 = vsub.f32 %v1056_v10, %v1081_v58  ;;  %1108 = vadd.xlane.f32.xlu1 %v1095_v33  ;;  %1110 = vadd.xlane.f32.xlu0 %v1096_v34 }
 0x2a2   : > { %v1097_v36 = vmul.f32 %v2005_v35, %v2005_v35 }
 0x2a4   : > { %1112 = vadd.xlane.f32.xlu1 %v1097_v36 }
 0x310   : > { %v1103_v59 = vpop.xlane.xlu0 %1102 }
 0x311   : > { %v1116_v44 = vmul.f32 0.0078125, %v1103_v59 }
 0x313   : > { %v1124_v45 = vadd.f32 1e-05, %v1116_v44 }
 0x314   : > { %v1105_v46 = vpop.xlane.xlu1 %1104  ;;  %v1099_v47 = vpop.xlane.xlu0 %1098 }
 0x315   : > { %1520 = vrsqrt.f32 %v1124_v45  ;;  %v1117_v48 = vmul.f32 0.0078125, %v1105_v46  ;;  %v1114_v50 = vmul.f32 0.0078125, %v1099_v47 }
 0x317   : > { %v1125_v51 = vadd.f32 1e-05, %v1117_v48  ;;  %v1122_v52 = vadd.f32 1e-05, %v1114_v50 }
 0x318   : > { %v1101_v7 = vpop.xlane.xlu1 %1100 }
 0x319   : > { %1522 = vrsqrt.f32 %v1125_v51  ;;  %v1115_v56 = vmul.f32 0.0078125, %v1101_v7 }
 0x31a   : > { %1524 = vrsqrt.f32 %v1122_v52 }
 0x31b   : > { %v1123_v57 = vadd.f32 1e-05, %v1115_v56 }
 0x31d   : > { %1526 = vrsqrt.f32 %v1123_v57 }
 0x322   : > { %v1521_v62 = vpop.eup %1520 }
 0x323   : > { %v1140_v24 = vmul.f32 %v1521_v62, %v1084_v12 }
 0x325   : > { %v1155_v39 = vmul.f32 %v1322_v8, %v1140_v24  ;;  %v1107_v4 = vpop.xlane.xlu0 %1106 }
 0x326   : > { %v1523_v60 = vpop.eup %1522  ;;  %v1118_v19 = vmul.f32 0.0078125, %v1107_v4 }
 0x327   : > { %v1525_v61 = vpop.eup %1524  ;;  %v1170_v40 = vadd.f32 %v1323_v32, %v1155_v39  ;;  %v1141_v49 = vmul.f32 %v1523_v60, %v1085_v41 }
 0x328   : > { %v1138_v0 = vmul.f32 %v1525_v61, %v1082_v43  ;;  %v1126_v2 = vadd.f32 1e-05, %v1118_v19 }
 0x329   : > { %1178 = vst [vmem:[%s2018_s20 + $0x10] sm:$0xff] %v1170_v40  ;;  %v1156_v3 = vmul.f32 %v1322_v8, %v1141_v49  ;;  %v1109_v10 = vpop.xlane.xlu1 %1108  ;;  %v1111_v12 = vpop.xlane.xlu0 %1110 }
 0x32a   : > { %v1527_v5 = vpop.eup %1526  ;;  %v1153_v6 = vmul.f32 %v1322_v8, %v1138_v0  ;;  %v1119_v9 = vmul.f32 0.0078125, %v1109_v10  ;;  %1528 = vrsqrt.f32 %v1126_v2  ;;  %v1120_v13 = vmul.f32 0.0078125, %v1111_v12 }
 0x32b   : > { %v1171_v53 = vadd.f32 %v1323_v32, %v1156_v3  ;;  %v1139_v1 = vmul.f32 %v1527_v5, %v1083_v54 }
 0x32c   : > { %v1168_v42 = vadd.f32 %v1323_v32, %v1153_v6  ;;  %v1127_v15 = vadd.f32 1e-05, %v1119_v9  ;;  %v1128_v11 = vadd.f32 1e-05, %v1120_v13 }
 0x32d   : > { %1179 = vst [vmem:[%s2018_s20 + $0x18] sm:$0xff] %v1171_v53  ;;  %v1154_v63 = vmul.f32 %v1322_v8, %v1139_v1  ;;  %v1113_v16 = vpop.xlane.xlu1 %1112 }
 0x32e   : > { %1176 = vst [vmem:[%s2018_s20] sm:$0xff] %v1168_v42  ;;  %1530 = vrsqrt.f32 %v1127_v15  ;;  %v1121_v43 = vmul.f32 0.0078125, %v1113_v16 }
 0x32f   : > { %v1169_v14 = vadd.f32 %v1323_v32, %v1154_v63  ;;  %1532 = vrsqrt.f32 %v1128_v11 }
 0x330   : > { %v1129_v41 = vadd.f32 1e-05, %v1121_v43 }
 0x331   : > { %1177 = vst [vmem:[%s2018_s20 + $0x8] sm:$0xff] %v1169_v14 }
 0x332   : > { %1534 = vrsqrt.f32 %v1129_v41 }
 0x337   : > { %v1529_v17 = vpop.eup %1528 }
 0x338   : > { %v1142_v20 = vmul.f32 %v1529_v17, %v1993_v23 }
 0x33a   : > { %v1157_v22 = vmul.f32 %v1322_v8, %v1142_v20 }
 0x33b   : > { %v1531_v21 = vpop.eup %1530 }
 0x33c   : > { %v1533_v54 = vpop.eup %1532  ;;  %v1143_v25 = vmul.f32 %v1531_v21, %v1997_v30  ;;  %v1172_v37 = vadd.f32 %v1323_v32, %v1157_v22 }
 0x33d   : > { %v1144_v26 = vmul.f32 %v1533_v54, %v1999_v31 }
 0x33e   : > { %v1158_v18 = vmul.f32 %v1322_v8, %v1143_v25  ;;  %1180 = vst [vmem:[%s2018_s20 + $0x20] sm:$0xff] %v1172_v37 }
 0x33f   : > { %v1535_v27 = vpop.eup %1534  ;;  %v1159_v28 = vmul.f32 %v1322_v8, %v1144_v26 }
 0x340   : > { %v1173_v38 = vadd.f32 %v1323_v32, %v1158_v18  ;;  %v1145_v23 = vmul.f32 %v1535_v27, %v2005_v35 }
 0x341   : > { %v1174_v29 = vadd.f32 %v1323_v32, %v1159_v28 }
 0x342   : > { %1181 = vst [vmem:[%s2018_s20 + $0x28] sm:$0xff] %v1173_v38  ;;  %v1160_v55 = vmul.f32 %v1322_v8, %v1145_v23 }
 0x343   : > { %1182 = vst [vmem:[%s2018_s20 + $0x30] sm:$0xff] %v1174_v29 }
 0x344   : > { %v1175_v30 = vadd.f32 %v1323_v32, %v1160_v55 }
 0x346   : > { %1183 = vst [vmem:[%s2018_s20 + $0x38] sm:$0xff] %v1175_v30 }
 0x347   : > { %1549 = shalt.err (!%p1546_p3)
}
 0x348   : > { %s1550_s27 = scalar_lea.hbm %s2036_s21, 1024  ;;  %s1554_s18 = scalar_lea.hbm %s2093_s10, 2048 }
 0x349   : > { %p1551_p4 = scmp.ne.s32.totalorder %s2036_s21, %s1550_s27  ;;  %p1555_p9 = scmp.lt.s32.totalorder %s2036_s21, %s2093_s10 }
 0x34a   : > { %p1556_p10 = scmp.lt.s32.totalorder %s1554_s18, %s1550_s27 }
 0x34b   : > { %p1552_p7 = pnand %p1551_p4, %p1694_p5 }
 0x34c   : > { %p1557_p11 = por %p1556_p10, %p1555_p9 }
 0x34d   : > { %p1553_p8 = pneg %p1552_p7 }
 0x34f   : > { %p1558_p12 = pnand %p1557_p11, %p1553_p8 }
 0x351   : > { %1561 = shalt.err (!%p1558_p12)
}
 0x352   : > { %s1599_s17 = smov 128   ;;  %s1600_s25 = smov 8  }
 0x353   : > { %1407 = dma.vmem_to_hbm [thread:$0]  (%p1694_p5), %s2038_s29, 1024, %s2036_s21, %s2043_s30, %s1599_s17, %s1599_s17, %s1600_s25  }
 0x354 PF: > { %p1413_p13 = scmp.ge.s32.totalorder %s1596_s16, 2  ;;  %s1213_s26 = sand.u32 1, %s1584_s13  }
 0x355   : > { %s1214_s28 = scalar_lea.sflag [#allocation3], %s1213_s26 }
 0x356   : > { %p1410_p0 = pnand %p1413_p13, %p1698_p6 }
 0x358   : > { %p1411_p1 = pneg %p1410_p0 }
 0x35a   : > { %1579 = dma.done.wait (%p1411_p1), %s1214_s28, 1024  }
 0x35b   : > { %1581 = vsyncadd (%p1411_p1), %s1214_s28, 4294966272  ;;  %s2097_s27 = sld [smem:[#allocation5_spill]]  ;;  %p20_p2 = scmp.ge.s32.totalorder %s1681_s19, 4  }
 0x35c   : > { %s2098_s13 = smov %s1588_s14  ;;  %s2099_s14 = smov %s1592_s15 }
 0x35d   : > { %s2101_s16 = smov %s1681_s19  ;;  %22 = sbr.rel (!%p20_p2) target bundleno = 3 (0x3), region = 101 }
 0x361   : > { %s2100_s15 = smov %s2097_s27 }
 0x362   :  { %1219 = vsyncpa [#allocation3], 1 }
 0x363   :  { %1221 = vsyncpa [#allocation3 + $0x1], 1 }

</bundles_post_ra>
